<compile_context>
chip_gen: v7x
topology: tpu7x:2x2x1
jax: 0.10.0
libtpu: 0.0.40
codegen_flags: <defaults>
</compile_context>

<pallas_src>
import math
from functools import partial

import jax
import jax.numpy as jnp
from jax import lax
from jax.experimental import pallas as pl
from jax.experimental.pallas import tpu as pltpu

REG_MAX = 16
ALPHA = 2.5
RATIO_POWER = 1.2
GAMMA_SCALE = 0.3
EPS = 1e-7
_LOG_ALPHA = math.log(ALPHA)
_HALF_PI = math.pi / 2.0


def _round_up(x, m):
    return ((x + m - 1) // m) * m


def _pow(x, p):
    # x ** p for non-integer p via exp/log (matches torch.pow for x > 0, gives 0 at x == 0).
    return jnp.exp(p * jnp.log(x))


def _atan(x):
    # Degree-9 odd minimax polynomial (A&S 4.4.49, |err| <= 1e-5 on [0,1]),
    # extended with atan(x) = pi/2 - atan(1/x) for |x| > 1 and odd symmetry.
    # Elementary ops only, so it lowers cleanly in Mosaic (no lax.atan needed).
    ax = jnp.abs(x)
    big = ax > 1.0
    z = jnp.where(big, 1.0 / ax, ax)
    z2 = z * z
    p = z * (0.9998660 + z2 * (-0.3302995 + z2 * (0.1801410 +
             z2 * (-0.0851330 + z2 * 0.0208351))))
    p = jnp.where(big, _HALF_PI - p, p)
    return jnp.where(x < 0.0, -p, p)


# ---------------------------------------------------------------------------
# Kernel 1: per-anchor CIoU, NWD + shape-aware penalty and DFL (all lane-dense),
#           masked, with in-kernel per-tile partial sums.
# ---------------------------------------------------------------------------
def _per_anchor_kernel(pd_ref, pb_ref, tb_ref, ap_ref, mask_ref,
                       iou_ref, sums_ref, *, exp_dtype):
    pb = pb_ref[...]                      # (4, TM) xyxy
    tb = tb_ref[...]                      # (4, TM) xyxy
    ap = ap_ref[...]                      # (2, TM)
    mask_f = mask_ref[...]                # (1, TM) float {0, 1}
    mask = mask_f > 0.0

    b1x1, b1y1, b1x2, b1y2 = pb[0:1], pb[1:2], pb[2:3], pb[3:4]
    b2x1, b2y1, b2x2, b2y2 = tb[0:1], tb[1:2], tb[2:3], tb[3:4]

    # ---- bbox_iou(pred, target, CIoU=True), boxes interpreted as xyxy ----
    w1 = b1x2 - b1x1
    h1 = b1y2 - b1y1 + EPS
    w2 = b2x2 - b2x1
    h2 = b2y2 - b2y1 + EPS
    inter = (jnp.maximum(jnp.minimum(b1x2, b2x2) - jnp.maximum(b1x1, b2x1), 0.0) *
             jnp.maximum(jnp.minimum(b1y2, b2y2) - jnp.maximum(b1y1, b2y1), 0.0))
    union = w1 * h1 + w2 * h2 - inter + EPS
    iou = inter / union
    cw = jnp.maximum(b1x2, b2x2) - jnp.minimum(b1x1, b2x1)
    ch = jnp.maximum(b1y2, b2y2) - jnp.minimum(b1y1, b2y1)
    c2 = cw * cw + ch * ch + EPS
    rho2 = ((b2x1 + b2x2 - b1x1 - b1x2) ** 2 +
            (b2y1 + b2y2 - b1y1 - b1y2) ** 2) * 0.25
    v = (4.0 / math.pi ** 2) * (_atan(w2 / h2) - _atan(w1 / h1)) ** 2
    alpha_c = v / (v - iou + (1.0 + EPS))
    ciou = iou - (rho2 / c2 + v * alpha_c)                     # (1, TM)

    # ---- Wasserstein distance + shape-aware penalty (xywh decomposition) ----
    cx_p = (b1x1 + b1x2) * 0.5
    cy_p = (b1y1 + b1y2) * 0.5
    wp = b1x2 - b1x1
    hp = b1y2 - b1y1
    cx_t = (b2x1 + b2x2) * 0.5
    cy_t = (b2y1 + b2y2) * 0.5
    wt = b2x2 - b2x1
    ht = b2y2 - b2y1
    nwd = (cx_p - cx_t) ** 2 + (cy_p - cy_t) ** 2 + \
        0.8 * ((wp - wt) ** 2 + (hp - ht) ** 2)
    w_pow = _pow(wt, RATIO_POWER)
    h_pow = _pow(ht, RATIO_POWER)
    denom = w_pow + h_pow + EPS
    ww = 2.0 * w_pow / denom
    hh = 2.0 * h_pow / denom
    om_w = jnp.minimum(jnp.abs(wp - wt) / (jnp.maximum(wp, wt) + EPS), 5.0)
    om_h = jnp.minimum(jnp.abs(hp - ht) / (jnp.maximum(hp, ht) + EPS), 5.0)
    loss_nwd = nwd + (ww * om_w * om_w + hh * om_h * om_h) * GAMMA_SCALE

    # ---- DFL: bbox2dist + distributed cross-entropy over reg_max bins ----
    pd = pd_ref[...]                       # (4*REG_MAX, TM), bins on sublanes
    tm = pd.shape[1]
    iota = lax.broadcasted_iota(jnp.int32, (REG_MAX, tm), 0)
    # ltrb target distances per side (anchor - target_lt, target_rb - anchor)
    sides = (ap[0:1] - b2x1, ap[1:2] - b2y1, b2x2 - ap[0:1], b2y2 - ap[1:2])
    dfl_acc = jnp.zeros((1, tm), jnp.float32)
    for s in range(4):                     # static unroll over ltrb sides
        t_s = jnp.clip(sides[s], 0.0, REG_MAX - 1 - 0.01)
        tl_s = t_s.astype(jnp.int32)
        wl_s = (tl_s + 1).astype(jnp.float32) - t_s
        wr_s = 1.0 - wl_s
        pd_s = pd[s * REG_MAX:(s + 1) * REG_MAX, :]          # (REG_MAX, TM)
        m = jnp.max(pd_s, axis=0, keepdims=True)             # (1, TM)
        e = jnp.exp((pd_s - m).astype(exp_dtype)).astype(jnp.float32)
        lse = m + jnp.log(jnp.sum(e, axis=0, keepdims=True))
        # fused one-hot: ce_l*wl + ce_r*wr == lse - sum(pd * (onehot_l*wl + onehot_r*wr))
        weight = (jnp.where(iota == tl_s, wl_s, 0.0) +
                  jnp.where(iota == tl_s + 1, wr_s, 0.0))
        dfl_acc = dfl_acc + (lse - jnp.sum(pd_s * weight, axis=0, keepdims=True))
    dfl = dfl_acc * 0.25                                      # mean over the 4 sides

    # ---- mask BEFORE any summation, then emit dense iou + per-tile sums ----
    zero = jnp.zeros_like(ciou)
    ciou_m = jnp.where(mask, ciou, zero)
    nwd_m = jnp.where(mask, loss_nwd, zero)
    dfl_m = jnp.where(mask, dfl, zero)

    iou_ref[...] = ciou_m                                     # dense lane-wide store

    sub = lax.broadcasted_iota(jnp.int32, (8, 128), 0)
    blk = (jnp.where(sub == 0, jnp.sum(ciou_m), 0.0) +
           jnp.where(sub == 1, jnp.sum(nwd_m), 0.0) +
           jnp.where(sub == 2, jnp.sum(dfl_m), 0.0) +
           jnp.where(sub == 3, jnp.sum(mask_f), 0.0))
    sums_ref[...] = blk[None, :, :]


# ---------------------------------------------------------------------------
# Kernel 2: dynamic alpha*-WIoU v3 (needs the masked mean of CIoU as a scalar),
#           emits per-tile masked partial sums only.
# ---------------------------------------------------------------------------
def _wiou_kernel(iou_ref, mask_ref, mean_ref, sums_ref):
    iou = iou_ref[...]                     # (1, TM), already 0 where mask is off
    mask = mask_ref[...] > 0.0
    iou_mean = mean_ref[0, 0]
    one_minus = 1.0 - iou
    beta = one_minus / (1.0 - iou_mean + EPS)
    r = beta * jnp.exp(-(beta - 1.0 + 0.001) * _LOG_ALPHA)     # beta / alpha**(beta-0.999)
    wiou = r * jnp.exp(ALPHA * jnp.log(one_minus))             # r * (1-iou)**alpha
    wiou = jnp.where(mask, wiou, jnp.zeros_like(wiou))
    sub = lax.broadcasted_iota(jnp.int32, (8, 128), 0)
    sums_ref[...] = jnp.where(sub == 0, jnp.sum(wiou), 0.0)[None, :, :]


# ---------------------------------------------------------------------------
# Wrapper == BboxLoss.forward
# ---------------------------------------------------------------------------
def bbox_loss_forward(pred_dist, pred_bboxes, anchor_points, target_bboxes,
                      target_scores, target_scores_sum, fg_mask,
                      epoch_ratio=0.0, tile_m=2048, dfl_exp_bf16=False):
    # target_scores / target_scores_sum are unused by this forward (as in torch).
    del target_scores, target_scores_sum
    B, N, _ = pred_bboxes.shape
    M = B * N

    # --- feature-major (SoA) layout: anchors on the lane axis ---
    pd = pred_dist.reshape(M, 4 * REG_MAX).astype(jnp.float32).T      # (64, M)
    pb = pred_bboxes.reshape(M, 4).astype(jnp.float32).T              # (4, M)
    tb = target_bboxes.reshape(M, 4).astype(jnp.float32).T            # (4, M)
    ap = jnp.broadcast_to(anchor_points[None].astype(jnp.float32),
                          (B, N, 2)).reshape(M, 2).T                  # (2, M)
    mask = fg_mask.reshape(1, M).astype(jnp.float32)                  # (1, M)

    # --- tile along the anchor (lane) axis; pad tail with mask=0 anchors ---
    tile = min(int(tile_m), _round_up(M, 128))
    tile = _round_up(tile, 128)
    m_pad = _round_up(M, tile)
    n_tiles = m_pad // tile
    pad = m_pad - M
    if pad:
        padc = ((0, 0), (0, pad))
        pd, pb, tb, ap, mask = [jnp.pad(x, padc) for x in (pd, pb, tb, ap, mask)]

    grid = (n_tiles,)

    def lane_spec(f):
        return pl.BlockSpec((f, tile), lambda i: (0, i))

    sums_spec = pl.BlockSpec((1, 8, 128), lambda i: (i, 0, 0))

    # v6e/v7x can set dfl_exp_bf16=True to push the DFL exp through the bf16 EUP
    # path; keep False on v5e (no bf16 VPU/EUP) and for bit-closer numerics.
    kernel1 = partial(_per_anchor_kernel,
                      exp_dtype=jnp.bfloat16 if dfl_exp_bf16 else jnp.float32)

    iou, sums1 = pl.pallas_call(
        kernel1,
        out_shape=(jax.ShapeDtypeStruct((1, m_pad), jnp.float32),
                   jax.ShapeDtypeStruct((n_tiles, 8, 128), jnp.float32)),
        grid_spec=pltpu.PrefetchScalarGridSpec(
            num_scalar_prefetch=0, grid=grid,
            in_specs=[lane_spec(4 * REG_MAX), lane_spec(4), lane_spec(4),
                      lane_spec(2), lane_spec(1)],
            out_specs=[lane_spec(1), sums_spec],
        ),
        compiler_params=pltpu.CompilerParams(dimension_semantics=("parallel",)),
    )(pd, pb, tb, ap, mask)

    totals = jnp.sum(sums1[:, :, 0], axis=0)          # (8,): [iou, nwd, dfl, count, 0...]
    iou_sum, nwd_sum, dfl_sum, count = totals[0], totals[1], totals[2], totals[3]
    safe = jnp.maximum(count, 1.0)
    iou_mean = (iou_sum / safe).reshape(1, 1)

    sums2 = pl.pallas_call(
        _wiou_kernel,
        out_shape=jax.ShapeDtypeStruct((n_tiles, 8, 128), jnp.float32),
        grid_spec=pltpu.PrefetchScalarGridSpec(
            num_scalar_prefetch=0, grid=grid,
            in_specs=[lane_spec(1), lane_spec(1),
                      pl.BlockSpec(memory_space=pltpu.MemorySpace.SMEM)],
            out_specs=sums_spec,
        ),
        compiler_params=pltpu.CompilerParams(dimension_semantics=("parallel",)),
    )(iou, mask, iou_mean)
    wiou_sum = jnp.sum(sums2[:, 0, 0])

    loss_nwd_mean = nwd_sum / safe
    loss_wiou_mean = wiou_sum / safe
    loss_dfl_mean = dfl_sum / safe
    current_ratio = 1.0 - epoch_ratio
    loss_iou = (0.7 * current_ratio * loss_nwd_mean +
                0.3 * (1.0 + epoch_ratio) * loss_wiou_mean)
    # TODO(synk): torch's `with torch.no_grad()` detach on iou_mean/beta only matters
    # for gradients; this forward is identical.
    has_fg = count > 0.0
    return (jnp.where(has_fg, loss_iou, 0.0).reshape(1),
            jnp.where(has_fg, loss_dfl_mean, 0.0).reshape(1))


# ---------------------------------------------------------------------------
# Pure-JAX reference (same masked-mean formulation) for a sanity check.
# ---------------------------------------------------------------------------
def bbox_loss_reference(pred_dist, pred_bboxes, anchor_points, target_bboxes,
                        target_scores, target_scores_sum, fg_mask, epoch_ratio=0.0):
    del target_scores, target_scores_sum
    B, N, _ = pred_bboxes.shape
    M = B * N
    pd = pred_dist.reshape(M, 4, REG_MAX).astype(jnp.float32)
    pb = pred_bboxes.reshape(M, 4).astype(jnp.float32)
    tb = target_bboxes.reshape(M, 4).astype(jnp.float32)
    ap = jnp.broadcast_to(anchor_points[None], (B, N, 2)).reshape(M, 2).astype(jnp.float32)
    m = fg_mask.reshape(M).astype(jnp.float32)
    cnt = jnp.maximum(jnp.sum(m), 1.0)

    b1x1, b1y1, b1x2, b1y2 = [pb[:, i] for i in range(4)]
    b2x1, b2y1, b2x2, b2y2 = [tb[:, i] for i in range(4)]
    w1, h1 = b1x2 - b1x1, b1y2 - b1y1 + EPS
    w2, h2 = b2x2 - b2x1, b2y2 - b2y1 + EPS
    inter = (jnp.maximum(jnp.minimum(b1x2, b2x2) - jnp.maximum(b1x1, b2x1), 0.0) *
             jnp.maximum(jnp.minimum(b1y2, b2y2) - jnp.maximum(b1y1, b2y1), 0.0))
    union = w1 * h1 + w2 * h2 - inter + EPS
    iou = inter / union
    cw = jnp.maximum(b1x2, b2x2) - jnp.minimum(b1x1, b2x1)
    ch = jnp.maximum(b1y2, b2y2) - jnp.minimum(b1y1, b2y1)
    c2 = cw ** 2 + ch ** 2 + EPS
    rho2 = ((b2x1 + b2x2 - b1x1 - b1x2) ** 2 + (b2y1 + b2y2 - b1y1 - b1y2) ** 2) / 4.0
    vterm = (4.0 / math.pi ** 2) * (jnp.arctan(w2 / h2) - jnp.arctan(w1 / h1)) ** 2
    ciou = iou - (rho2 / c2 + vterm * (vterm / (vterm - iou + 1.0 + EPS)))

    cxp, cyp, wp, hp = (b1x1 + b1x2) / 2, (b1y1 + b1y2) / 2, b1x2 - b1x1, b1y2 - b1y1
    cxt, cyt, wt, ht = (b2x1 + b2x2) / 2, (b2y1 + b2y2) / 2, b2x2 - b2x1, b2y2 - b2y1
    nwd = (cxp - cxt) ** 2 + (cyp - cyt) ** 2 + 0.8 * ((wp - wt) ** 2 + (hp - ht) ** 2)
    w_pow, h_pow = wt ** RATIO_POWER, ht ** RATIO_POWER
    ww = 2 * w_pow / (w_pow + h_pow + EPS)
    hh = 2 * h_pow / (w_pow + h_pow + EPS)
    ow = jnp.minimum(jnp.abs(wp - wt) / (jnp.maximum(wp, wt) + EPS), 5.0)
    oh = jnp.minimum(jnp.abs(hp - ht) / (jnp.maximum(hp, ht) + EPS), 5.0)
    loss_nwd = nwd + (ww * ow ** 2 + hh * oh ** 2) * GAMMA_SCALE

    iou_mean = jnp.sum(ciou * m) / cnt
    beta = (1.0 - ciou) / (1.0 - iou_mean + EPS)
    r = beta / ALPHA ** (beta - 1.0 + 0.001)
    wiou = r * (1.0 - ciou) ** ALPHA

    tgt = jnp.clip(jnp.concatenate([ap - tb[:, :2], tb[:, 2:] - ap], -1), 0.0, REG_MAX - 1 - 0.01)
    tl = tgt.astype(jnp.int32)
    tr = tl + 1
    wl = tr.astype(jnp.float32) - tgt
    wr = 1.0 - wl
    lse = jax.scipy.special.logsumexp(pd, axis=-1)
    ce_l = lse - jnp.take_along_axis(pd, tl[..., None], axis=-1)[..., 0]
    ce_r = lse - jnp.take_along_axis(pd, tr[..., None], axis=-1)[..., 0]
    dfl = jnp.mean(ce_l * wl + ce_r * wr, axis=-1)

    loss_nwd_mean = jnp.sum(loss_nwd * m) / cnt
    loss_wiou_mean = jnp.sum(wiou * m) / cnt
    loss_dfl = jnp.sum(dfl * m) / cnt
    cr = 1.0 - epoch_ratio
    loss_iou = 0.7 * cr * loss_nwd_mean + 0.3 * (1 + epoch_ratio) * loss_wiou_mean
    has = jnp.sum(m) > 0
    return (jnp.where(has, loss_iou, 0.0).reshape(1),
            jnp.where(has, loss_dfl, 0.0).reshape(1))


if __name__ == "__main__":
    key = jax.random.PRNGKey(0)
    B, NC = 2, 4
    k1, k2, k3, k4, k5, k6 = jax.random.split(key, 6)

    # 8x10 anchor grid with 0.5 offset -> (80, 2); M = 160 is NOT a multiple of the
    # lane tile, so the padding / tail-masking path is exercised too.
    xs = jnp.arange(10, dtype=jnp.float32) + 0.5
    ys = jnp.arange(8, dtype=jnp.float32) + 0.5
    gx, gy = jnp.meshgrid(xs, ys, indexing="xy")
    anchor_points = jnp.stack([gx.reshape(-1), gy.reshape(-1)], axis=-1)
    N = anchor_points.shape[0]          # 80

    t_wh = jax.random.uniform(k1, (B, N, 2), minval=1.0, maxval=5.0)
    t_c = anchor_points[None] + jax.random.uniform(k2, (B, N, 2), minval=-0.5, maxval=0.5)
    target_bboxes = jnp.concatenate([t_c - t_wh / 2, t_c + t_wh / 2], axis=-1)

    p_wh = jax.random.uniform(k3, (B, N, 2), minval=0.5, maxval=5.5)
    p_c = anchor_points[None] + jax.random.uniform(k4, (B, N, 2), minval=-1.0, maxval=1.0)
    pred_bboxes = jnp.concatenate([p_c - p_wh / 2, p_c + p_wh / 2], axis=-1)

    pred_dist = jax.random.normal(k5, (B, N, 4 * REG_MAX), dtype=jnp.float32)
    fg_mask = jax.random.uniform(k6, (B, N)) > 0.4
    target_scores = jax.random.uniform(key, (B, N, NC))
    target_scores_sum = jnp.sum(target_scores)

    loss_iou, loss_dfl = bbox_loss_forward(
        pred_dist, pred_bboxes, anchor_points, target_bboxes,
        target_scores, target_scores_sum, fg_mask, epoch_ratio=0.2)
    jax.block_until_ready((loss_iou, loss_dfl))

    ref_iou, ref_dfl = bbox_loss_reference(
        pred_dist, pred_bboxes, anchor_points, target_bboxes,
        target_scores, target_scores_sum, fg_mask, epoch_ratio=0.2)

    assert jnp.allclose(loss_iou, ref_iou, rtol=5e-3, atol=5e-3), (loss_iou, ref_iou)
    assert jnp.allclose(loss_dfl, ref_dfl, rtol=5e-3, atol=5e-3), (loss_dfl, ref_dfl)
    print("KERNEL_OK")
</pallas_src>

<mosaic_0001>
module attributes {stable_mosaic.version = 11 : i64} {
  func.func @_per_anchor_kernel(%arg0: i32, %arg1: memref<64x256xf32, #tpu.memory_space<vmem>>, %arg2: memref<4x256xf32, #tpu.memory_space<vmem>>, %arg3: memref<4x256xf32, #tpu.memory_space<vmem>>, %arg4: memref<2x256xf32, #tpu.memory_space<vmem>>, %arg5: memref<1x256xf32, #tpu.memory_space<vmem>>, %arg6: memref<1x256xf32, #tpu.memory_space<vmem>>, %arg7: memref<1x8x128xf32, #tpu.memory_space<vmem>>) attributes {dimension_semantics = [#tpu.dimension_semantics<parallel>], iteration_bounds = array<i64: 1>, scalar_prefetch = 0 : i64, scratch_operands = 0 : i64, tpu.core_type = #tpu.core_type<tc>, window_params = [{transform_indices = @transform_0, window_bounds = array<i64: 64, 256>}, {transform_indices = @transform_1, window_bounds = array<i64: 4, 256>}, {transform_indices = @transform_2, window_bounds = array<i64: 4, 256>}, {transform_indices = @transform_3, window_bounds = array<i64: 2, 256>}, {transform_indices = @transform_4, window_bounds = array<i64: 1, 256>}, {transform_indices = @transform_5, window_bounds = array<i64: 1, 256>}, {transform_indices = @transform_6, window_bounds = array<i64: 1, 8, 128>}]} {
    %c0 = arith.constant 0 : index
    %c0_0 = arith.constant 0 : index
    %0 = vector.load %arg2[%c0, %c0_0] : memref<4x256xf32, #tpu.memory_space<vmem>>, vector<4x256xf32>
    %c0_1 = arith.constant 0 : index
    %c0_2 = arith.constant 0 : index
    %1 = vector.load %arg3[%c0_1, %c0_2] : memref<4x256xf32, #tpu.memory_space<vmem>>, vector<4x256xf32>
    %c0_3 = arith.constant 0 : index
    %c0_4 = arith.constant 0 : index
    %2 = vector.load %arg4[%c0_3, %c0_4] : memref<2x256xf32, #tpu.memory_space<vmem>>, vector<2x256xf32>
    %c0_5 = arith.constant 0 : index
    %c0_6 = arith.constant 0 : index
    %3 = vector.load %arg5[%c0_5, %c0_6] : memref<1x256xf32, #tpu.memory_space<vmem>>, vector<1x256xf32>
    %cst = arith.constant 0.000000e+00 : f32
    %4 = vector.broadcast %cst : f32 to vector<1x256xf32>
    %5 = arith.cmpf ogt, %3, %4 : vector<1x256xf32>
    %6 = vector.extract_strided_slice %0 {offsets = [0, 0], sizes = [1, 256], strides = [1, 1]} : vector<4x256xf32> to vector<1x256xf32>
    %7 = vector.extract_strided_slice %0 {offsets = [1, 0], sizes = [1, 256], strides = [1, 1]} : vector<4x256xf32> to vector<1x256xf32>
    %8 = vector.extract_strided_slice %0 {offsets = [2, 0], sizes = [1, 256], strides = [1, 1]} : vector<4x256xf32> to vector<1x256xf32>
    %9 = vector.extract_strided_slice %0 {offsets = [3, 0], sizes = [1, 256], strides = [1, 1]} : vector<4x256xf32> to vector<1x256xf32>
    %10 = vector.extract_strided_slice %1 {offsets = [0, 0], sizes = [1, 256], strides = [1, 1]} : vector<4x256xf32> to vector<1x256xf32>
    %11 = vector.extract_strided_slice %1 {offsets = [1, 0], sizes = [1, 256], strides = [1, 1]} : vector<4x256xf32> to vector<1x256xf32>
    %12 = vector.extract_strided_slice %1 {offsets = [2, 0], sizes = [1, 256], strides = [1, 1]} : vector<4x256xf32> to vector<1x256xf32>
    %13 = vector.extract_strided_slice %1 {offsets = [3, 0], sizes = [1, 256], strides = [1, 1]} : vector<4x256xf32> to vector<1x256xf32>
    %14 = arith.subf %8, %6 : vector<1x256xf32>
    %15 = arith.subf %9, %7 : vector<1x256xf32>
    %cst_7 = arith.constant 1.000000e-07 : f32
    %16 = vector.broadcast %cst_7 : f32 to vector<1x256xf32>
    %17 = arith.addf %15, %16 : vector<1x256xf32>
    %18 = arith.subf %12, %10 : vector<1x256xf32>
    %19 = arith.subf %13, %11 : vector<1x256xf32>
    %cst_8 = arith.constant 1.000000e-07 : f32
    %20 = vector.broadcast %cst_8 : f32 to vector<1x256xf32>
    %21 = arith.addf %19, %20 : vector<1x256xf32>
    %22 = arith.minimumf %8, %12 : vector<1x256xf32>
    %23 = arith.maximumf %6, %10 : vector<1x256xf32>
    %24 = arith.subf %22, %23 : vector<1x256xf32>
    %cst_9 = arith.constant 0.000000e+00 : f32
    %25 = vector.broadcast %cst_9 : f32 to vector<1x256xf32>
    %26 = arith.maximumf %24, %25 : vector<1x256xf32>
    %27 = arith.minimumf %9, %13 : vector<1x256xf32>
    %28 = arith.maximumf %7, %11 : vector<1x256xf32>
    %29 = arith.subf %27, %28 : vector<1x256xf32>
    %cst_10 = arith.constant 0.000000e+00 : f32
    %30 = vector.broadcast %cst_10 : f32 to vector<1x256xf32>
    %31 = arith.maximumf %29, %30 : vector<1x256xf32>
    %32 = arith.mulf %26, %31 : vector<1x256xf32>
    %33 = arith.mulf %14, %17 : vector<1x256xf32>
    %34 = arith.mulf %18, %21 : vector<1x256xf32>
    %35 = arith.addf %33, %34 : vector<1x256xf32>
    %36 = arith.subf %35, %32 : vector<1x256xf32>
    %cst_11 = arith.constant 1.000000e-07 : f32
    %37 = vector.broadcast %cst_11 : f32 to vector<1x256xf32>
    %38 = arith.addf %36, %37 : vector<1x256xf32>
    %39 = arith.divf %32, %38 : vector<1x256xf32>
    %40 = arith.maximumf %8, %12 : vector<1x256xf32>
    %41 = arith.minimumf %6, %10 : vector<1x256xf32>
    %42 = arith.subf %40, %41 : vector<1x256xf32>
    %43 = arith.maximumf %9, %13 : vector<1x256xf32>
    %44 = arith.minimumf %7, %11 : vector<1x256xf32>
    %45 = arith.subf %43, %44 : vector<1x256xf32>
    %46 = arith.mulf %42, %42 : vector<1x256xf32>
    %47 = arith.mulf %45, %45 : vector<1x256xf32>
    %48 = arith.addf %46, %47 : vector<1x256xf32>
    %cst_12 = arith.constant 1.000000e-07 : f32
    %49 = vector.broadcast %cst_12 : f32 to vector<1x256xf32>
    %50 = arith.addf %48, %49 : vector<1x256xf32>
    %51 = arith.addf %10, %12 : vector<1x256xf32>
    %52 = arith.subf %51, %6 : vector<1x256xf32>
    %53 = arith.subf %52, %8 : vector<1x256xf32>
    %54 = arith.mulf %53, %53 : vector<1x256xf32>
    %55 = arith.addf %11, %13 : vector<1x256xf32>
    %56 = arith.subf %55, %7 : vector<1x256xf32>
    %57 = arith.subf %56, %9 : vector<1x256xf32>
    %58 = arith.mulf %57, %57 : vector<1x256xf32>
    %59 = arith.addf %54, %58 : vector<1x256xf32>
    %cst_13 = arith.constant 2.500000e-01 : f32
    %60 = vector.broadcast %cst_13 : f32 to vector<1x256xf32>
    %61 = arith.mulf %59, %60 : vector<1x256xf32>
    %62 = arith.divf %18, %21 : vector<1x256xf32>
    %63 = math.absf %62 : vector<1x256xf32>
    %cst_14 = arith.constant 1.000000e+00 : f32
    %64 = vector.broadcast %cst_14 : f32 to vector<1x256xf32>
    %65 = arith.cmpf ogt, %63, %64 : vector<1x256xf32>
    %cst_15 = arith.constant 1.000000e+00 : f32
    %66 = vector.broadcast %cst_15 : f32 to vector<1x256xf32>
    %67 = arith.divf %66, %63 : vector<1x256xf32>
    %68 = arith.select %65, %67, %63 : vector<1x256xi1>, vector<1x256xf32>
    %69 = arith.mulf %68, %68 : vector<1x256xf32>
    %cst_16 = arith.constant 2.083510e-02 : f32
    %70 = vector.broadcast %cst_16 : f32 to vector<1x256xf32>
    %71 = arith.mulf %69, %70 : vector<1x256xf32>
    %cst_17 = arith.constant -8.513300e-02 : f32
    %72 = vector.broadcast %cst_17 : f32 to vector<1x256xf32>
    %73 = arith.addf %72, %71 : vector<1x256xf32>
    %74 = arith.mulf %69, %73 : vector<1x256xf32>
    %cst_18 = arith.constant 1.801410e-01 : f32
    %75 = vector.broadcast %cst_18 : f32 to vector<1x256xf32>
    %76 = arith.addf %75, %74 : vector<1x256xf32>
    %77 = arith.mulf %69, %76 : vector<1x256xf32>
    %cst_19 = arith.constant -0.330299497 : f32
    %78 = vector.broadcast %cst_19 : f32 to vector<1x256xf32>
    %79 = arith.addf %78, %77 : vector<1x256xf32>
    %80 = arith.mulf %69, %79 : vector<1x256xf32>
    %cst_20 = arith.constant 9.998660e-01 : f32
    %81 = vector.broadcast %cst_20 : f32 to vector<1x256xf32>
    %82 = arith.addf %81, %80 : vector<1x256xf32>
    %83 = arith.mulf %68, %82 : vector<1x256xf32>
    %cst_21 = arith.constant 1.57079637 : f32
    %84 = vector.broadcast %cst_21 : f32 to vector<1x256xf32>
    %85 = arith.subf %84, %83 : vector<1x256xf32>
    %86 = arith.select %65, %85, %83 : vector<1x256xi1>, vector<1x256xf32>
    %cst_22 = arith.constant 0.000000e+00 : f32
    %87 = vector.broadcast %cst_22 : f32 to vector<1x256xf32>
    %88 = arith.cmpf olt, %62, %87 : vector<1x256xf32>
    %cst_23 = arith.constant 0.000000e+00 : f32
    %89 = vector.broadcast %cst_23 : f32 to vector<1x256xf32>
    %90 = arith.subf %89, %86 : vector<1x256xf32>
    %91 = arith.select %88, %90, %86 : vector<1x256xi1>, vector<1x256xf32>
    %92 = arith.divf %14, %17 : vector<1x256xf32>
    %93 = math.absf %92 : vector<1x256xf32>
    %cst_24 = arith.constant 1.000000e+00 : f32
    %94 = vector.broadcast %cst_24 : f32 to vector<1x256xf32>
    %95 = arith.cmpf ogt, %93, %94 : vector<1x256xf32>
    %cst_25 = arith.constant 1.000000e+00 : f32
    %96 = vector.broadcast %cst_25 : f32 to vector<1x256xf32>
    %97 = arith.divf %96, %93 : vector<1x256xf32>
    %98 = arith.select %95, %97, %93 : vector<1x256xi1>, vector<1x256xf32>
    %99 = arith.mulf %98, %98 : vector<1x256xf32>
    %cst_26 = arith.constant 2.083510e-02 : f32
    %100 = vector.broadcast %cst_26 : f32 to vector<1x256xf32>
    %101 = arith.mulf %99, %100 : vector<1x256xf32>
    %cst_27 = arith.constant -8.513300e-02 : f32
    %102 = vector.broadcast %cst_27 : f32 to vector<1x256xf32>
    %103 = arith.addf %102, %101 : vector<1x256xf32>
    %104 = arith.mulf %99, %103 : vector<1x256xf32>
    %cst_28 = arith.constant 1.801410e-01 : f32
    %105 = vector.broadcast %cst_28 : f32 to vector<1x256xf32>
    %106 = arith.addf %105, %104 : vector<1x256xf32>
    %107 = arith.mulf %99, %106 : vector<1x256xf32>
    %cst_29 = arith.constant -0.330299497 : f32
    %108 = vector.broadcast %cst_29 : f32 to vector<1x256xf32>
    %109 = arith.addf %108, %107 : vector<1x256xf32>
    %110 = arith.mulf %99, %109 : vector<1x256xf32>
    %cst_30 = arith.constant 9.998660e-01 : f32
    %111 = vector.broadcast %cst_30 : f32 to vector<1x256xf32>
    %112 = arith.addf %111, %110 : vector<1x256xf32>
    %113 = arith.mulf %98, %112 : vector<1x256xf32>
    %cst_31 = arith.constant 1.57079637 : f32
    %114 = vector.broadcast %cst_31 : f32 to vector<1x256xf32>
    %115 = arith.subf %114, %113 : vector<1x256xf32>
    %116 = arith.select %95, %115, %113 : vector<1x256xi1>, vector<1x256xf32>
    %cst_32 = arith.constant 0.000000e+00 : f32
    %117 = vector.broadcast %cst_32 : f32 to vector<1x256xf32>
    %118 = arith.cmpf olt, %92, %117 : vector<1x256xf32>
    %cst_33 = arith.constant 0.000000e+00 : f32
    %119 = vector.broadcast %cst_33 : f32 to vector<1x256xf32>
    %120 = arith.subf %119, %116 : vector<1x256xf32>
    %121 = arith.select %118, %120, %116 : vector<1x256xi1>, vector<1x256xf32>
    %122 = arith.subf %91, %121 : vector<1x256xf32>
    %123 = arith.mulf %122, %122 : vector<1x256xf32>
    %cst_34 = arith.constant 0.405284733 : f32
    %124 = vector.broadcast %cst_34 : f32 to vector<1x256xf32>
    %125 = arith.mulf %124, %123 : vector<1x256xf32>
    %126 = arith.subf %125, %39 : vector<1x256xf32>
    %cst_35 = arith.constant 1.00000012 : f32
    %127 = vector.broadcast %cst_35 : f32 to vector<1x256xf32>
    %128 = arith.addf %126, %127 : vector<1x256xf32>
    %129 = arith.divf %125, %128 : vector<1x256xf32>
    %130 = arith.divf %61, %50 : vector<1x256xf32>
    %131 = arith.mulf %125, %129 : vector<1x256xf32>
    %132 = arith.addf %130, %131 : vector<1x256xf32>
    %133 = arith.subf %39, %132 : vector<1x256xf32>
    %134 = arith.addf %6, %8 : vector<1x256xf32>
    %cst_36 = arith.constant 5.000000e-01 : f32
    %135 = vector.broadcast %cst_36 : f32 to vector<1x256xf32>
    %136 = arith.mulf %134, %135 : vector<1x256xf32>
    %137 = arith.addf %7, %9 : vector<1x256xf32>
    %cst_37 = arith.constant 5.000000e-01 : f32
    %138 = vector.broadcast %cst_37 : f32 to vector<1x256xf32>
    %139 = arith.mulf %137, %138 : vector<1x256xf32>
    %140 = arith.subf %8, %6 : vector<1x256xf32>
    %141 = arith.subf %9, %7 : vector<1x256xf32>
    %142 = arith.addf %10, %12 : vector<1x256xf32>
    %cst_38 = arith.constant 5.000000e-01 : f32
    %143 = vector.broadcast %cst_38 : f32 to vector<1x256xf32>
    %144 = arith.mulf %142, %143 : vector<1x256xf32>
    %145 = arith.addf %11, %13 : vector<1x256xf32>
    %cst_39 = arith.constant 5.000000e-01 : f32
    %146 = vector.broadcast %cst_39 : f32 to vector<1x256xf32>
    %147 = arith.mulf %145, %146 : vector<1x256xf32>
    %148 = arith.subf %12, %10 : vector<1x256xf32>
    %149 = arith.subf %13, %11 : vector<1x256xf32>
    %150 = arith.subf %136, %144 : vector<1x256xf32>
    %151 = arith.mulf %150, %150 : vector<1x256xf32>
    %152 = arith.subf %139, %147 : vector<1x256xf32>
    %153 = arith.mulf %152, %152 : vector<1x256xf32>
    %154 = arith.addf %151, %153 : vector<1x256xf32>
    %155 = arith.subf %140, %148 : vector<1x256xf32>
    %156 = arith.mulf %155, %155 : vector<1x256xf32>
    %157 = arith.subf %141, %149 : vector<1x256xf32>
    %158 = arith.mulf %157, %157 : vector<1x256xf32>
    %159 = arith.addf %156, %158 : vector<1x256xf32>
    %cst_40 = arith.constant 8.000000e-01 : f32
    %160 = vector.broadcast %cst_40 : f32 to vector<1x256xf32>
    %161 = arith.mulf %160, %159 : vector<1x256xf32>
    %162 = arith.addf %154, %161 : vector<1x256xf32>
    %163 = math.log %148 : vector<1x256xf32>
    %cst_41 = arith.constant 1.200000e+00 : f32
    %164 = vector.broadcast %cst_41 : f32 to vector<1x256xf32>
    %165 = arith.mulf %164, %163 : vector<1x256xf32>
    %166 = math.exp %165 : vector<1x256xf32>
    %167 = math.log %149 : vector<1x256xf32>
    %cst_42 = arith.constant 1.200000e+00 : f32
    %168 = vector.broadcast %cst_42 : f32 to vector<1x256xf32>
    %169 = arith.mulf %168, %167 : vector<1x256xf32>
    %170 = math.exp %169 : vector<1x256xf32>
    %171 = arith.addf %166, %170 : vector<1x256xf32>
    %cst_43 = arith.constant 1.000000e-07 : f32
    %172 = vector.broadcast %cst_43 : f32 to vector<1x256xf32>
    %173 = arith.addf %171, %172 : vector<1x256xf32>
    %cst_44 = arith.constant 2.000000e+00 : f32
    %174 = vector.broadcast %cst_44 : f32 to vector<1x256xf32>
    %175 = arith.mulf %174, %166 : vector<1x256xf32>
    %176 = arith.divf %175, %173 : vector<1x256xf32>
    %cst_45 = arith.constant 2.000000e+00 : f32
    %177 = vector.broadcast %cst_45 : f32 to vector<1x256xf32>
    %178 = arith.mulf %177, %170 : vector<1x256xf32>
    %179 = arith.divf %178, %173 : vector<1x256xf32>
    %180 = arith.subf %140, %148 : vector<1x256xf32>
    %181 = math.absf %180 : vector<1x256xf32>
    %182 = arith.maximumf %140, %148 : vector<1x256xf32>
    %cst_46 = arith.constant 1.000000e-07 : f32
    %183 = vector.broadcast %cst_46 : f32 to vector<1x256xf32>
    %184 = arith.addf %182, %183 : vector<1x256xf32>
    %185 = arith.divf %181, %184 : vector<1x256xf32>
    %cst_47 = arith.constant 5.000000e+00 : f32
    %186 = vector.broadcast %cst_47 : f32 to vector<1x256xf32>
    %187 = arith.minimumf %185, %186 : vector<1x256xf32>
    %188 = arith.subf %141, %149 : vector<1x256xf32>
    %189 = math.absf %188 : vector<1x256xf32>
    %190 = arith.maximumf %141, %149 : vector<1x256xf32>
    %cst_48 = arith.constant 1.000000e-07 : f32
    %191 = vector.broadcast %cst_48 : f32 to vector<1x256xf32>
    %192 = arith.addf %190, %191 : vector<1x256xf32>
    %193 = arith.divf %189, %192 : vector<1x256xf32>
    %cst_49 = arith.constant 5.000000e+00 : f32
    %194 = vector.broadcast %cst_49 : f32 to vector<1x256xf32>
    %195 = arith.minimumf %193, %194 : vector<1x256xf32>
    %196 = arith.mulf %176, %187 : vector<1x256xf32>
    %197 = arith.mulf %196, %187 : vector<1x256xf32>
    %198 = arith.mulf %179, %195 : vector<1x256xf32>
    %199 = arith.mulf %198, %195 : vector<1x256xf32>
    %200 = arith.addf %197, %199 : vector<1x256xf32>
    %cst_50 = arith.constant 3.000000e-01 : f32
    %201 = vector.broadcast %cst_50 : f32 to vector<1x256xf32>
    %202 = arith.mulf %200, %201 : vector<1x256xf32>
    %203 = arith.addf %162, %202 : vector<1x256xf32>
    %c0_51 = arith.constant 0 : index
    %c0_52 = arith.constant 0 : index
    %204 = vector.load %arg1[%c0_51, %c0_52] : memref<64x256xf32, #tpu.memory_space<vmem>>, vector<64x256xf32>
    %205 = tpu.iota {dimensions = array<i32: 0>} : vector<16x256xi32>
    %206 = vector.extract_strided_slice %2 {offsets = [0, 0], sizes = [1, 256], strides = [1, 1]} : vector<2x256xf32> to vector<1x256xf32>
    %207 = arith.subf %206, %10 : vector<1x256xf32>
    %208 = vector.extract_strided_slice %2 {offsets = [1, 0], sizes = [1, 256], strides = [1, 1]} : vector<2x256xf32> to vector<1x256xf32>
    %209 = arith.subf %208, %11 : vector<1x256xf32>
    %210 = vector.extract_strided_slice %2 {offsets = [0, 0], sizes = [1, 256], strides = [1, 1]} : vector<2x256xf32> to vector<1x256xf32>
    %211 = arith.subf %12, %210 : vector<1x256xf32>
    %212 = vector.extract_strided_slice %2 {offsets = [1, 0], sizes = [1, 256], strides = [1, 1]} : vector<2x256xf32> to vector<1x256xf32>
    %213 = arith.subf %13, %212 : vector<1x256xf32>
    %cst_53 = arith.constant 0.000000e+00 : f32
    %214 = vector.broadcast %cst_53 : f32 to vector<1x256xf32>
    %cst_54 = arith.constant 0.000000e+00 : f32
    %cst_55 = arith.constant 1.499000e+01 : f32
    %215 = vector.broadcast %cst_54 : f32 to vector<1x256xf32>
    %216 = arith.maximumf %215, %207 : vector<1x256xf32>
    %217 = vector.broadcast %cst_55 : f32 to vector<1x256xf32>
    %218 = arith.minimumf %217, %216 : vector<1x256xf32>
    %219 = arith.fptosi %218 : vector<1x256xf32> to vector<1x256xi32>
    %c1_i32 = arith.constant 1 : i32
    %220 = vector.broadcast %c1_i32 : i32 to vector<1x256xi32>
    %221 = arith.addi %219, %220 : vector<1x256xi32>
    %222 = arith.sitofp %221 : vector<1x256xi32> to vector<1x256xf32>
    %223 = arith.subf %222, %218 : vector<1x256xf32>
    %cst_56 = arith.constant 1.000000e+00 : f32
    %224 = vector.broadcast %cst_56 : f32 to vector<1x256xf32>
    %225 = arith.subf %224, %223 : vector<1x256xf32>
    %226 = vector.extract_strided_slice %204 {offsets = [0, 0], sizes = [16, 256], strides = [1, 1]} : vector<64x256xf32> to vector<16x256xf32>
    %cst_57 = arith.constant dense<0xFF800000> : vector<256xf32>
    %227 = vector.multi_reduction <maximumf>, %226, %cst_57 [0] : vector<16x256xf32> to vector<256xf32>
    %228 = vector.shape_cast %227 : vector<256xf32> to vector<1x256xf32>
    %229 = vector.broadcast %228 : vector<1x256xf32> to vector<16x256xf32>
    %230 = arith.subf %226, %229 : vector<16x256xf32>
    %231 = math.exp %230 : vector<16x256xf32>
    %cst_58 = arith.constant dense<0.000000e+00> : vector<256xf32>
    %232 = vector.multi_reduction <add>, %231, %cst_58 [0] : vector<16x256xf32> to vector<256xf32>
    %233 = vector.shape_cast %232 : vector<256xf32> to vector<1x256xf32>
    %234 = math.log %233 : vector<1x256xf32>
    %235 = arith.addf %228, %234 : vector<1x256xf32>
    %236 = vector.broadcast %219 : vector<1x256xi32> to vector<16x256xi32>
    %237 = arith.cmpi eq, %205, %236 : vector<16x256xi32>
    %cst_59 = arith.constant 0.000000e+00 : f32
    %238 = vector.shape_cast %223 : vector<1x256xf32> to vector<1x256xf32>
    %239 = vector.broadcast %238 : vector<1x256xf32> to vector<16x256xf32>
    %240 = vector.broadcast %cst_59 : f32 to vector<16x256xf32>
    %241 = arith.select %237, %239, %240 : vector<16x256xi1>, vector<16x256xf32>
    %c1_i32_60 = arith.constant 1 : i32
    %242 = vector.broadcast %c1_i32_60 : i32 to vector<1x256xi32>
    %243 = arith.addi %219, %242 : vector<1x256xi32>
    %244 = vector.broadcast %243 : vector<1x256xi32> to vector<16x256xi32>
    %245 = arith.cmpi eq, %205, %244 : vector<16x256xi32>
    %cst_61 = arith.constant 0.000000e+00 : f32
    %246 = vector.shape_cast %225 : vector<1x256xf32> to vector<1x256xf32>
    %247 = vector.broadcast %246 : vector<1x256xf32> to vector<16x256xf32>
    %248 = vector.broadcast %cst_61 : f32 to vector<16x256xf32>
    %249 = arith.select %245, %247, %248 : vector<16x256xi1>, vector<16x256xf32>
    %250 = arith.addf %241, %249 : vector<16x256xf32>
    %251 = arith.mulf %226, %250 : vector<16x256xf32>
    %cst_62 = arith.constant dense<0.000000e+00> : vector<256xf32>
    %252 = vector.multi_reduction <add>, %251, %cst_62 [0] : vector<16x256xf32> to vector<256xf32>
    %253 = vector.shape_cast %252 : vector<256xf32> to vector<1x256xf32>
    %254 = arith.subf %235, %253 : vector<1x256xf32>
    %255 = arith.addf %214, %254 : vector<1x256xf32>
    %cst_63 = arith.constant 0.000000e+00 : f32
    %cst_64 = arith.constant 1.499000e+01 : f32
    %256 = vector.broadcast %cst_63 : f32 to vector<1x256xf32>
    %257 = arith.maximumf %256, %209 : vector<1x256xf32>
    %258 = vector.broadcast %cst_64 : f32 to vector<1x256xf32>
    %259 = arith.minimumf %258, %257 : vector<1x256xf32>
    %260 = arith.fptosi %259 : vector<1x256xf32> to vector<1x256xi32>
    %c1_i32_65 = arith.constant 1 : i32
    %261 = vector.broadcast %c1_i32_65 : i32 to vector<1x256xi32>
    %262 = arith.addi %260, %261 : vector<1x256xi32>
    %263 = arith.sitofp %262 : vector<1x256xi32> to vector<1x256xf32>
    %264 = arith.subf %263, %259 : vector<1x256xf32>
    %cst_66 = arith.constant 1.000000e+00 : f32
    %265 = vector.broadcast %cst_66 : f32 to vector<1x256xf32>
    %266 = arith.subf %265, %264 : vector<1x256xf32>
    %267 = vector.extract_strided_slice %204 {offsets = [16, 0], sizes = [16, 256], strides = [1, 1]} : vector<64x256xf32> to vector<16x256xf32>
    %cst_67 = arith.constant dense<0xFF800000> : vector<256xf32>
    %268 = vector.multi_reduction <maximumf>, %267, %cst_67 [0] : vector<16x256xf32> to vector<256xf32>
    %269 = vector.shape_cast %268 : vector<256xf32> to vector<1x256xf32>
    %270 = vector.broadcast %269 : vector<1x256xf32> to vector<16x256xf32>
    %271 = arith.subf %267, %270 : vector<16x256xf32>
    %272 = math.exp %271 : vector<16x256xf32>
    %cst_68 = arith.constant dense<0.000000e+00> : vector<256xf32>
    %273 = vector.multi_reduction <add>, %272, %cst_68 [0] : vector<16x256xf32> to vector<256xf32>
    %274 = vector.shape_cast %273 : vector<256xf32> to vector<1x256xf32>
    %275 = math.log %274 : vector<1x256xf32>
    %276 = arith.addf %269, %275 : vector<1x256xf32>
    %277 = vector.broadcast %260 : vector<1x256xi32> to vector<16x256xi32>
    %278 = arith.cmpi eq, %205, %277 : vector<16x256xi32>
    %cst_69 = arith.constant 0.000000e+00 : f32
    %279 = vector.shape_cast %264 : vector<1x256xf32> to vector<1x256xf32>
    %280 = vector.broadcast %279 : vector<1x256xf32> to vector<16x256xf32>
    %281 = vector.broadcast %cst_69 : f32 to vector<16x256xf32>
    %282 = arith.select %278, %280, %281 : vector<16x256xi1>, vector<16x256xf32>
    %c1_i32_70 = arith.constant 1 : i32
    %283 = vector.broadcast %c1_i32_70 : i32 to vector<1x256xi32>
    %284 = arith.addi %260, %283 : vector<1x256xi32>
    %285 = vector.broadcast %284 : vector<1x256xi32> to vector<16x256xi32>
    %286 = arith.cmpi eq, %205, %285 : vector<16x256xi32>
    %cst_71 = arith.constant 0.000000e+00 : f32
    %287 = vector.shape_cast %266 : vector<1x256xf32> to vector<1x256xf32>
    %288 = vector.broadcast %287 : vector<1x256xf32> to vector<16x256xf32>
    %289 = vector.broadcast %cst_71 : f32 to vector<16x256xf32>
    %290 = arith.select %286, %288, %289 : vector<16x256xi1>, vector<16x256xf32>
    %291 = arith.addf %282, %290 : vector<16x256xf32>
    %292 = arith.mulf %267, %291 : vector<16x256xf32>
    %cst_72 = arith.constant dense<0.000000e+00> : vector<256xf32>
    %293 = vector.multi_reduction <add>, %292, %cst_72 [0] : vector<16x256xf32> to vector<256xf32>
    %294 = vector.shape_cast %293 : vector<256xf32> to vector<1x256xf32>
    %295 = arith.subf %276, %294 : vector<1x256xf32>
    %296 = arith.addf %255, %295 : vector<1x256xf32>
    %cst_73 = arith.constant 0.000000e+00 : f32
    %cst_74 = arith.constant 1.499000e+01 : f32
    %297 = vector.broadcast %cst_73 : f32 to vector<1x256xf32>
    %298 = arith.maximumf %297, %211 : vector<1x256xf32>
    %299 = vector.broadcast %cst_74 : f32 to vector<1x256xf32>
    %300 = arith.minimumf %299, %298 : vector<1x256xf32>
    %301 = arith.fptosi %300 : vector<1x256xf32> to vector<1x256xi32>
    %c1_i32_75 = arith.constant 1 : i32
    %302 = vector.broadcast %c1_i32_75 : i32 to vector<1x256xi32>
    %303 = arith.addi %301, %302 : vector<1x256xi32>
    %304 = arith.sitofp %303 : vector<1x256xi32> to vector<1x256xf32>
    %305 = arith.subf %304, %300 : vector<1x256xf32>
    %cst_76 = arith.constant 1.000000e+00 : f32
    %306 = vector.broadcast %cst_76 : f32 to vector<1x256xf32>
    %307 = arith.subf %306, %305 : vector<1x256xf32>
    %308 = vector.extract_strided_slice %204 {offsets = [32, 0], sizes = [16, 256], strides = [1, 1]} : vector<64x256xf32> to vector<16x256xf32>
    %cst_77 = arith.constant dense<0xFF800000> : vector<256xf32>
    %309 = vector.multi_reduction <maximumf>, %308, %cst_77 [0] : vector<16x256xf32> to vector<256xf32>
    %310 = vector.shape_cast %309 : vector<256xf32> to vector<1x256xf32>
    %311 = vector.broadcast %310 : vector<1x256xf32> to vector<16x256xf32>
    %312 = arith.subf %308, %311 : vector<16x256xf32>
    %313 = math.exp %312 : vector<16x256xf32>
    %cst_78 = arith.constant dense<0.000000e+00> : vector<256xf32>
    %314 = vector.multi_reduction <add>, %313, %cst_78 [0] : vector<16x256xf32> to vector<256xf32>
    %315 = vector.shape_cast %314 : vector<256xf32> to vector<1x256xf32>
    %316 = math.log %315 : vector<1x256xf32>
    %317 = arith.addf %310, %316 : vector<1x256xf32>
    %318 = vector.broadcast %301 : vector<1x256xi32> to vector<16x256xi32>
    %319 = arith.cmpi eq, %205, %318 : vector<16x256xi32>
    %cst_79 = arith.constant 0.000000e+00 : f32
    %320 = vector.shape_cast %305 : vector<1x256xf32> to vector<1x256xf32>
    %321 = vector.broadcast %320 : vector<1x256xf32> to vector<16x256xf32>
    %322 = vector.broadcast %cst_79 : f32 to vector<16x256xf32>
    %323 = arith.select %319, %321, %322 : vector<16x256xi1>, vector<16x256xf32>
    %c1_i32_80 = arith.constant 1 : i32
    %324 = vector.broadcast %c1_i32_80 : i32 to vector<1x256xi32>
    %325 = arith.addi %301, %324 : vector<1x256xi32>
    %326 = vector.broadcast %325 : vector<1x256xi32> to vector<16x256xi32>
    %327 = arith.cmpi eq, %205, %326 : vector<16x256xi32>
    %cst_81 = arith.constant 0.000000e+00 : f32
    %328 = vector.shape_cast %307 : vector<1x256xf32> to vector<1x256xf32>
    %329 = vector.broadcast %328 : vector<1x256xf32> to vector<16x256xf32>
    %330 = vector.broadcast %cst_81 : f32 to vector<16x256xf32>
    %331 = arith.select %327, %329, %330 : vector<16x256xi1>, vector<16x256xf32>
    %332 = arith.addf %323, %331 : vector<16x256xf32>
    %333 = arith.mulf %308, %332 : vector<16x256xf32>
    %cst_82 = arith.constant dense<0.000000e+00> : vector<256xf32>
    %334 = vector.multi_reduction <add>, %333, %cst_82 [0] : vector<16x256xf32> to vector<256xf32>
    %335 = vector.shape_cast %334 : vector<256xf32> to vector<1x256xf32>
    %336 = arith.subf %317, %335 : vector<1x256xf32>
    %337 = arith.addf %296, %336 : vector<1x256xf32>
    %cst_83 = arith.constant 0.000000e+00 : f32
    %cst_84 = arith.constant 1.499000e+01 : f32
    %338 = vector.broadcast %cst_83 : f32 to vector<1x256xf32>
    %339 = arith.maximumf %338, %213 : vector<1x256xf32>
    %340 = vector.broadcast %cst_84 : f32 to vector<1x256xf32>
    %341 = arith.minimumf %340, %339 : vector<1x256xf32>
    %342 = arith.fptosi %341 : vector<1x256xf32> to vector<1x256xi32>
    %c1_i32_85 = arith.constant 1 : i32
    %343 = vector.broadcast %c1_i32_85 : i32 to vector<1x256xi32>
    %344 = arith.addi %342, %343 : vector<1x256xi32>
    %345 = arith.sitofp %344 : vector<1x256xi32> to vector<1x256xf32>
    %346 = arith.subf %345, %341 : vector<1x256xf32>
    %cst_86 = arith.constant 1.000000e+00 : f32
    %347 = vector.broadcast %cst_86 : f32 to vector<1x256xf32>
    %348 = arith.subf %347, %346 : vector<1x256xf32>
    %349 = vector.extract_strided_slice %204 {offsets = [48, 0], sizes = [16, 256], strides = [1, 1]} : vector<64x256xf32> to vector<16x256xf32>
    %cst_87 = arith.constant dense<0xFF800000> : vector<256xf32>
    %350 = vector.multi_reduction <maximumf>, %349, %cst_87 [0] : vector<16x256xf32> to vector<256xf32>
    %351 = vector.shape_cast %350 : vector<256xf32> to vector<1x256xf32>
    %352 = vector.broadcast %351 : vector<1x256xf32> to vector<16x256xf32>
    %353 = arith.subf %349, %352 : vector<16x256xf32>
    %354 = math.exp %353 : vector<16x256xf32>
    %cst_88 = arith.constant dense<0.000000e+00> : vector<256xf32>
    %355 = vector.multi_reduction <add>, %354, %cst_88 [0] : vector<16x256xf32> to vector<256xf32>
    %356 = vector.shape_cast %355 : vector<256xf32> to vector<1x256xf32>
    %357 = math.log %356 : vector<1x256xf32>
    %358 = arith.addf %351, %357 : vector<1x256xf32>
    %359 = vector.broadcast %342 : vector<1x256xi32> to vector<16x256xi32>
    %360 = arith.cmpi eq, %205, %359 : vector<16x256xi32>
    %cst_89 = arith.constant 0.000000e+00 : f32
    %361 = vector.shape_cast %346 : vector<1x256xf32> to vector<1x256xf32>
    %362 = vector.broadcast %361 : vector<1x256xf32> to vector<16x256xf32>
    %363 = vector.broadcast %cst_89 : f32 to vector<16x256xf32>
    %364 = arith.select %360, %362, %363 : vector<16x256xi1>, vector<16x256xf32>
    %c1_i32_90 = arith.constant 1 : i32
    %365 = vector.broadcast %c1_i32_90 : i32 to vector<1x256xi32>
    %366 = arith.addi %342, %365 : vector<1x256xi32>
    %367 = vector.broadcast %366 : vector<1x256xi32> to vector<16x256xi32>
    %368 = arith.cmpi eq, %205, %367 : vector<16x256xi32>
    %cst_91 = arith.constant 0.000000e+00 : f32
    %369 = vector.shape_cast %348 : vector<1x256xf32> to vector<1x256xf32>
    %370 = vector.broadcast %369 : vector<1x256xf32> to vector<16x256xf32>
    %371 = vector.broadcast %cst_91 : f32 to vector<16x256xf32>
    %372 = arith.select %368, %370, %371 : vector<16x256xi1>, vector<16x256xf32>
    %373 = arith.addf %364, %372 : vector<16x256xf32>
    %374 = arith.mulf %349, %373 : vector<16x256xf32>
    %cst_92 = arith.constant dense<0.000000e+00> : vector<256xf32>
    %375 = vector.multi_reduction <add>, %374, %cst_92 [0] : vector<16x256xf32> to vector<256xf32>
    %376 = vector.shape_cast %375 : vector<256xf32> to vector<1x256xf32>
    %377 = arith.subf %358, %376 : vector<1x256xf32>
    %378 = arith.addf %337, %377 : vector<1x256xf32>
    %cst_93 = arith.constant 2.500000e-01 : f32
    %379 = vector.broadcast %cst_93 : f32 to vector<1x256xf32>
    %380 = arith.mulf %378, %379 : vector<1x256xf32>
    %cst_94 = arith.constant 0.000000e+00 : f32
    %381 = vector.broadcast %cst_94 : f32 to vector<1x256xf32>
    %382 = arith.select %5, %133, %381 : vector<1x256xi1>, vector<1x256xf32>
    %383 = arith.select %5, %203, %381 : vector<1x256xi1>, vector<1x256xf32>
    %384 = arith.select %5, %380, %381 : vector<1x256xi1>, vector<1x256xf32>
    %c0_95 = arith.constant 0 : index
    %c0_96 = arith.constant 0 : index
    %385 = vector.load %arg6[%c0_95, %c0_96] : memref<1x256xf32, #tpu.memory_space<vmem>>, vector<1x256xf32>
    tpu.vector_store %arg6[%c0_95, %c0_96], %382 {strides = array<i32>} : memref<1x256xf32, #tpu.memory_space<vmem>>, vector<1x256xf32>,
    %386 = tpu.iota {dimensions = array<i32: 0>} : vector<8x128xi32>
    %c0_i32 = arith.constant 0 : i32
    %387 = vector.broadcast %c0_i32 : i32 to vector<8x128xi32>
    %388 = arith.cmpi eq, %386, %387 : vector<8x128xi32>
    %389 = vector.shape_cast %382 : vector<1x256xf32> to vector<1x1x256xf32>
    %cst_97 = arith.constant dense<0.000000e+00> : vector<1xf32>
    %390 = vector.multi_reduction <add>, %389, %cst_97 [1, 2] : vector<1x1x256xf32> to vector<1xf32>
    %391 = vector.shape_cast %390 : vector<1xf32> to vector<1x1x1xf32>
    %392 = vector.extract %391[0, 0, 0] : f32 from vector<1x1x1xf32>
    %cst_98 = arith.constant 0.000000e+00 : f32
    %393 = vector.broadcast %392 : f32 to vector<8x128xf32>
    %394 = vector.broadcast %cst_98 : f32 to vector<8x128xf32>
    %395 = arith.select %388, %393, %394 : vector<8x128xi1>, vector<8x128xf32>
    %c1_i32_99 = arith.constant 1 : i32
    %396 = vector.broadcast %c1_i32_99 : i32 to vector<8x128xi32>
    %397 = arith.cmpi eq, %386, %396 : vector<8x128xi32>
    %398 = vector.shape_cast %383 : vector<1x256xf32> to vector<1x1x256xf32>
    %cst_100 = arith.constant dense<0.000000e+00> : vector<1xf32>
    %399 = vector.multi_reduction <add>, %398, %cst_100 [1, 2] : vector<1x1x256xf32> to vector<1xf32>
    %400 = vector.shape_cast %399 : vector<1xf32> to vector<1x1x1xf32>
    %401 = vector.extract %400[0, 0, 0] : f32 from vector<1x1x1xf32>
    %cst_101 = arith.constant 0.000000e+00 : f32
    %402 = vector.broadcast %401 : f32 to vector<8x128xf32>
    %403 = vector.broadcast %cst_101 : f32 to vector<8x128xf32>
    %404 = arith.select %397, %402, %403 : vector<8x128xi1>, vector<8x128xf32>
    %405 = arith.addf %395, %404 : vector<8x128xf32>
    %c2_i32 = arith.constant 2 : i32
    %406 = vector.broadcast %c2_i32 : i32 to vector<8x128xi32>
    %407 = arith.cmpi eq, %386, %406 : vector<8x128xi32>
    %408 = vector.shape_cast %384 : vector<1x256xf32> to vector<1x1x256xf32>
    %cst_102 = arith.constant dense<0.000000e+00> : vector<1xf32>
    %409 = vector.multi_reduction <add>, %408, %cst_102 [1, 2] : vector<1x1x256xf32> to vector<1xf32>
    %410 = vector.shape_cast %409 : vector<1xf32> to vector<1x1x1xf32>
    %411 = vector.extract %410[0, 0, 0] : f32 from vector<1x1x1xf32>
    %cst_103 = arith.constant 0.000000e+00 : f32
    %412 = vector.broadcast %411 : f32 to vector<8x128xf32>
    %413 = vector.broadcast %cst_103 : f32 to vector<8x128xf32>
    %414 = arith.select %407, %412, %413 : vector<8x128xi1>, vector<8x128xf32>
    %415 = arith.addf %405, %414 : vector<8x128xf32>
    %c3_i32 = arith.constant 3 : i32
    %416 = vector.broadcast %c3_i32 : i32 to vector<8x128xi32>
    %417 = arith.cmpi eq, %386, %416 : vector<8x128xi32>
    %418 = vector.shape_cast %3 : vector<1x256xf32> to vector<1x1x256xf32>
    %cst_104 = arith.constant dense<0.000000e+00> : vector<1xf32>
    %419 = vector.multi_reduction <add>, %418, %cst_104 [1, 2] : vector<1x1x256xf32> to vector<1xf32>
    %420 = vector.shape_cast %419 : vector<1xf32> to vector<1x1x1xf32>
    %421 = vector.extract %420[0, 0, 0] : f32 from vector<1x1x1xf32>
    %cst_105 = arith.constant 0.000000e+00 : f32
    %422 = vector.broadcast %421 : f32 to vector<8x128xf32>
    %423 = vector.broadcast %cst_105 : f32 to vector<8x128xf32>
    %424 = arith.select %417, %422, %423 : vector<8x128xi1>, vector<8x128xf32>
    %425 = arith.addf %415, %424 : vector<8x128xf32>
    %426 = vector.shape_cast %425 : vector<8x128xf32> to vector<1x8x128xf32>
    %c0_106 = arith.constant 0 : index
    %c0_107 = arith.constant 0 : index
    %c0_108 = arith.constant 0 : index
    %427 = vector.load %arg7[%c0_106, %c0_107, %c0_108] : memref<1x8x128xf32, #tpu.memory_space<vmem>>, vector<1x8x128xf32>
    tpu.vector_store %arg7[%c0_106, %c0_107, %c0_108], %426 {strides = array<i32>} : memref<1x8x128xf32, #tpu.memory_space<vmem>>, vector<1x8x128xf32>,
    return
  }
  func.func @transform_0(%arg0: i32) -> (i32, i32) {
    %c0_i32 = arith.constant 0 : i32
    %c0_i32_0 = arith.constant 0 : i32
    return %c0_i32, %arg0 : i32, i32
  }
  func.func @transform_1(%arg0: i32) -> (i32, i32) {
    %c0_i32 = arith.constant 0 : i32
    %c0_i32_0 = arith.constant 0 : i32
    return %c0_i32, %arg0 : i32, i32
  }
  func.func @transform_2(%arg0: i32) -> (i32, i32) {
    %c0_i32 = arith.constant 0 : i32
    %c0_i32_0 = arith.constant 0 : i32
    return %c0_i32, %arg0 : i32, i32
  }
  func.func @transform_3(%arg0: i32) -> (i32, i32) {
    %c0_i32 = arith.constant 0 : i32
    %c0_i32_0 = arith.constant 0 : i32
    return %c0_i32, %arg0 : i32, i32
  }
  func.func @transform_4(%arg0: i32) -> (i32, i32) {
    %c0_i32 = arith.constant 0 : i32
    %c0_i32_0 = arith.constant 0 : i32
    return %c0_i32, %arg0 : i32, i32
  }
  func.func @transform_5(%arg0: i32) -> (i32, i32) {
    %c0_i32 = arith.constant 0 : i32
    %c0_i32_0 = arith.constant 0 : i32
    return %c0_i32, %arg0 : i32, i32
  }
  func.func @transform_6(%arg0: i32) -> (i32, i32, i32) {
    %c0_i32 = arith.constant 0 : i32
    %c0_i32_0 = arith.constant 0 : i32
    %c0_i32_1 = arith.constant 0 : i32
    return %arg0, %c0_i32, %c0_i32_0 : i32, i32, i32
  }
}

</mosaic_0001>

<bundles_post_ra>
// kernel: tpu_custom_call.1
= control target key start
LH: loop header
LB: loop body
LE: loop exit
PB: predicated region body
PF: predicated region fallthrough
CT: control target
= control target key end

     0   :  { %12 = vsyncpa [#allocation3], 0  ;;  %s2036_s0 = inlined_call_operand.hbm [shape: f32[64,256], index: 0, kind: input, shape index: {}]   ;;  %s2037_s1 = inlined_call_operand.hbm [shape: f32[4,256], index: 1, kind: input, shape index: {}]   ;;  %s2038_s2 = inlined_call_operand.hbm [shape: f32[4,256], index: 2, kind: input, shape index: {}]   ;;  %s2039_s3 = inlined_call_operand.vmem [shape: f32[2,256], index: 3, kind: input, shape index: {}]   ;;  %s2040_s4 = inlined_call_operand.vmem [shape: f32[1,256], index: 4, kind: input, shape index: {}]   ;;  %s2041_s5 = inlined_call_operand.hbm [shape: f32[1,256], index: 5, kind: output, shape index: {0}]   ;;  %s2042_s6 = inlined_call_operand.hbm [shape: f32[1,8,128], index: 6, kind: output, shape index: {1}]  }
   0x1   :  { %13 = vsyncpa [#allocation6], 0 }
   0x2   :  { %14 = vsyncpa [#allocation4], 0 }
   0x3   :  { %15 = vsyncpa [#allocation10], 0  ;;  %s1383_s21 = smov [#allocation5]   ;;  %s1384_s23 = smov [#allocation2]  }
   0x4   :  { %s34_s22 = sshll.u32 %s1383_s21, 4  ;;  %s21_s24 = sshll.u32 %s1384_s23, 4  ;;  %s35_s22 = int_to_ptr.vmem [resolvable:$true] %s34_s22  ;;  %s1429_s24 = int_to_ptr.vmem [resolvable:$true] %s21_s24 }
   0x5   :  { %s1265_s27 = scalar_lea.hbm %s2037_s1, 128 }
   0x6   :  { %p1266_p0 = scmp.ne.s32.totalorder %s2037_s1, %s1265_s27  ;;  %p1269_p1 = scmp.lt.u32.totalorder %s1265_s27, %s2037_s1 }
   0x8   :  { %p1271_p2 = pnand %p1269_p1, %p1266_p0 }
   0xa   :  { %1274 = shalt.err (!%p1271_p2)
}
   0xb   :  { %s1275_s8 = scalar_lea.vmem %s35_s22, 128  ;;  %p1280_p4 = scmp.lt.s32.totalorder %s35_s22, %s35_s22 }
   0xc   :  { %p1276_p3 = scmp.ne.s32.totalorder %s35_s22, %s1275_s8  ;;  %p1281_p5 = scmp.lt.s32.totalorder %s1275_s8, %s1275_s8 }
   0xe   :  { %p1282_p6 = por %p1281_p5, %p1280_p4 }
  0x10   :  { %p1283_p7 = pnand %p1282_p6, %p1276_p3 }
  0x12   :  { %1286 = shalt.err (!%p1283_p7)
}
  0x13   :  { %37 = dma.hbm_to_vmem [thread:$0]  %s2037_s1, 128, %s35_s22, [#allocation6]  }
  0x14   :  { %s1287_s13 = scalar_lea.hbm %s2036_s0, 2048 }
  0x15   :  { %p1288_p8 = scmp.ne.s32.totalorder %s2036_s0, %s1287_s13  ;;  %p1291_p9 = scmp.lt.u32.totalorder %s1287_s13, %s2036_s0 }
  0x17   :  { %p1293_p10 = pnand %p1291_p9, %p1288_p8 }
  0x19   :  { %1296 = shalt.err (!%p1293_p10)
}
  0x1a   :  { %s1297_s18 = scalar_lea.vmem %s1429_s24, 2048  ;;  %p1302_p12 = scmp.lt.s32.totalorder %s1429_s24, %s1429_s24 }
  0x1b   :  { %p1298_p11 = scmp.ne.s32.totalorder %s1429_s24, %s1297_s18  ;;  %p1303_p13 = scmp.lt.s32.totalorder %s1297_s18, %s1297_s18 }
  0x1d   :  { %p1304_p0 = por %p1303_p13, %p1302_p12 }
  0x1f   :  { %p1305_p1 = pnand %p1304_p0, %p1298_p11 }
  0x21   :  { %1308 = shalt.err (!%p1305_p1)
}
  0x22   :  { %s1385_s1 = smov 256   ;;  %s1386_s19 = smov 16  }
  0x23   :  { %27 = dma.hbm_to_vmem [thread:$0]  %s2036_s0, 2048, %s1429_s24, [#allocation3], %s1385_s1, %s1385_s1, %s1386_s19  }
  0x24   :  { %s1387_s22 = smov [#allocation7]   ;;  %s1309_s27 = scalar_lea.hbm %s2038_s2, 128 }
  0x25   :  { %s44_s23 = sshll.u32 %s1387_s22, 4  ;;  %p1310_p2 = scmp.ne.s32.totalorder %s2038_s2, %s1309_s27  ;;  %s45_s23 = int_to_ptr.vmem [resolvable:$true] %s44_s23 }
  0x26   :  { %p1313_p3 = scmp.lt.u32.totalorder %s1309_s27, %s2038_s2 }
  0x28   :  { %p1315_p4 = pnand %p1313_p3, %p1310_p2 }
  0x2a   :  { %1318 = shalt.err (!%p1315_p4)
}
  0x2b   :  { %s1319_s8 = scalar_lea.vmem %s45_s23, 128  ;;  %p1324_p6 = scmp.lt.s32.totalorder %s45_s23, %s45_s23 }
  0x2c   :  { %p1320_p5 = scmp.ne.s32.totalorder %s45_s23, %s1319_s8  ;;  %p1325_p7 = scmp.lt.s32.totalorder %s1319_s8, %s1319_s8 }
  0x2e   :  { %p1326_p8 = por %p1325_p7, %p1324_p6 }
  0x30   :  { %p1327_p9 = pnand %p1326_p8, %p1320_p5 }
  0x32   :  { %1330 = shalt.err (!%p1327_p9)
}
  0x33   :  { %47 = dma.hbm_to_vmem [thread:$0]  %s2038_s2, 128, %s45_s23, [#allocation6]  }
  0x34   :  { %1375 = dma.done.wait [#allocation3], 2048  }
  0x35   :  { %1376 = vsyncadd [#allocation3], 4294965248 }
  0x36   :  { %1377 = dma.done.wait [#allocation6], 256  }
  0x37   :  { %1378 = vsyncadd [#allocation6], 4294967040  ;;  %v2043_v0 = vlaneseq  ;;  %v1388_v1 = vmov 1983009808   ;;  %v1476_v6 = vld [vmem:[#allocation7] sm:$0xff]  ;;  %v1483_v8 = vld [vmem:[#allocation2] sm:$0xff] }
  0x38   :  { %v278_v2 = vunpack.c.l.s4 %v1388_v1  ;;  %v1481_v7 = vld [vmem:[%s2039_s3] sm:$0xf]  ;;  %v1485_v9 = vld [vmem:[#allocation2 + $0x8] sm:$0xff]  ;;  %v1487_v10 = vld [vmem:[#allocation2 + $0x10] sm:$0xff]  ;;  %v1389_v35 = vmov 572653568  }
  0x39   :  { %v1473_v3 = vshrl.u32 %v2043_v0, 7  ;;  %v1490_v12 = vld [vmem:[#allocation2 + $0x18] sm:$0xff]  ;;  %v1492_v13 = vld [vmem:[#allocation2 + $0x20] sm:$0xff]  ;;  %v1494_v14 = vld [vmem:[#allocation2 + $0x28] sm:$0xff]  ;;  %v312_v15 = vmax.f32 %v1483_v8, %v1487_v10  ;;  %v288_v36 = vunpack.c.l.s4 %v1389_v35 }
  0x3a   :  { %v279_v4 = vunpack.c.0.s8 %v278_v2  ;;  %v1498_v16 = vld [vmem:[#allocation2 + $0x30] sm:$0xff]  ;;  %v1500_v17 = vld [vmem:[#allocation2 + $0x38] sm:$0xff]  ;;  %v319_v19 = vmax.f32 %v1485_v9, %v1490_v12 }
  0x3b   :  { %v313_v20 = vrot.slane %v312_v15, 4  ;;  %v470_v21 = vmax.f32 %v1492_v13, %v1498_v16  ;;  %v477_v22 = vmax.f32 %v1494_v14, %v1500_v17  ;;  %v1510_v38 = vsub.s32 0, %v1473_v3 }
  0x3c   :  { %v282_v5 = vsub.s32 %v279_v4, %v1473_v3  ;;  %v320_v24 = vrot.slane %v319_v19, 4  ;;  %v289_v46 = vunpack.c.0.s8 %v288_v36  ;;  %v1522_v49 = vsub.s32 2, %v1473_v3 }
  0x3d   :  { %v314_v25 = vmax.f32 %v312_v15, %v313_v20  ;;  %v471_v26 = vrot.slane %v470_v21, 4  ;;  %v478_v27 = vrot.slane %v477_v22, 4  ;;  %v1549_v4 = vadd.s32 8, %v1473_v3 }
  0x3e   :  { %v283_v11 = vrot.slane %v1476_v6, %v282_v5  ;;  %v321_v29 = vmax.f32 %v319_v19, %v320_v24  ;;  %v292_v58 = vsub.s32 %v289_v46, %v1473_v3 }
  0x3f   :  { %v315_v30 = vrot.slane %v314_v25, 2  ;;  %v472_v31 = vmax.f32 %v470_v21, %v471_v26  ;;  %v479_v34 = vmax.f32 %v477_v22, %v478_v27 }
  0x40   :  { %v285_v18 = vsub.f32 %v1481_v7, %v283_v11  ;;  %v322_v33 = vrot.slane %v321_v29, 2  ;;  %v293_v21 = vrot.slane %v1481_v7, %v292_v58 }
  0x41   :  { %v316_v37 = vmax.f32 %v314_v25, %v315_v30  ;;  %v473_v42 = vrot.slane %v472_v31, 2  ;;  %v480_v45 = vrot.slane %v479_v34, 2 }
  0x42   :  { %v305_v23 = vmax.f32 %v285_v18, 0.0  ;;  %v323_v40 = vmax.f32 %v321_v29, %v322_v33  ;;  %v1574_v33 = vld [vmem:[#allocation2 + $0x40] sm:$0xff] }
  0x43   :  { %v317_v41 = vrot.slane %v316_v37, 1  ;;  %v474_v53 = vmax.f32 %v472_v31, %v473_v42  ;;  %v481_v57 = vmax.f32 %v479_v34, %v480_v45  ;;  %v1576_v34 = vld [vmem:[#allocation2 + $0x50] sm:$0xff] }
  0x44   :  { %v306_v28 = vmin.f32 %v305_v23, 14.99  ;;  %v324_v44 = vrot.slane %v323_v40, 1 }
  0x45   :  { %v1517_v47 = vmax.f32 %v316_v37, %v317_v41  ;;  %v475_v19 = vrot.slane %v474_v53, 1  ;;  %v482_v20 = vrot.slane %v481_v57, 1 }
  0x46   :  { %v1167_v32 = vtrunc.f32 %v306_v28  ;;  %v1525_v51 = vmax.f32 %v323_v40, %v324_v44 }
  0x47   :  { %v326_v52 = vsub.f32 %v1483_v8, %v1517_v47  ;;  %v328_v59 = vsub.f32 %v1487_v10, %v1517_v47  ;;  %v1568_v30 = vmax.f32 %v474_v53, %v475_v19  ;;  %v1570_v31 = vmax.f32 %v481_v57, %v482_v20 }
  0x48   :  { %v1512_v39 = vcvt.f32.s32 %v1167_v32  ;;  %v327_v55 = vsub.f32 %v1485_v9, %v1525_v51  ;;  %v329_v63 = vsub.f32 %v1490_v12, %v1525_v51  ;;  %v295_v32 = vsub.f32 %v1476_v6, %v293_v21 }
  0x49   :  { %v330_v1 = vmul.f32 1.442695, %v326_v52  ;;  %v334_v22 = vmul.f32 1.442695, %v328_v59  ;;  %v484_v44 = vsub.f32 %v1492_v13, %v1568_v30  ;;  %v485_v45 = vsub.f32 %v1494_v14, %v1570_v31 }
  0x4a   :  { %v1515_v43 = vadd.s32 1, %v1512_v39  ;;  %v361_v48 = vrot.slane %v1512_v39, %v1510_v38  ;;  %v365_v60 = vrot.slane %v1512_v39, %v1522_v49  ;;  %v332_v5 = vmul.f32 1.442695, %v327_v55 }
  0x4b   :  { %1192 = vpow2.f32 %v330_v1  ;;  %v336_v24 = vmul.f32 1.442695, %v329_v63  ;;  %v486_v46 = vsub.f32 %v1498_v16, %v1568_v30  ;;  %v487_v52 = vsub.f32 %v1500_v17, %v1570_v31 }
  0x4c   :  { %v309_v50 = vcvt.s32.f32 %v1515_v43  ;;  %v404_v56 = vrot.slane %v1515_v43, %v1510_v38  ;;  %v369_v61 = vrot.slane %v361_v48, %v1510_v38  ;;  %v408_v2 = vrot.slane %v1515_v43, %v1522_v49  ;;  %v1594_v48 = vld [vmem:[#allocation2 + $0x48] sm:$0xff] }
  0x4d   :  { %v373_v23 = vrot.slane %v365_v60, %v1510_v38  ;;  %1194 = vpow2.f32 %v332_v5  ;;  %v633_v53 = vmax.f32 %v1574_v33, %v1576_v34  ;;  %v1390_v55 = vmov 858984721  }
  0x4e   :  { %v1529_v54 = vsub.f32 %v309_v50, %v306_v28  ;;  %v412_v15 = vrot.slane %v404_v56, %v1510_v38  ;;  %vm374_vm0 = vcmp.eq.s32.totalorder %v1473_v3, %v369_v61  ;;  %v416_v26 = vrot.slane %v408_v2, %v1510_v38  ;;  %v1596_v50 = vld [vmem:[#allocation2 + $0x58] sm:$0xff] }
  0x4f   :  { %vm376_vm1 = vcmp.eq.s32.totalorder %v1549_v4, %v369_v61  ;;  %1196 = vpow2.f32 %v334_v22  ;;  %vm375_vm4 = vcmp.eq.s32.totalorder %v1473_v3, %v373_v23  ;;  %vm377_vm6 = vcmp.eq.s32.totalorder %v1549_v4, %v373_v23 }
  0x50   :  { %v1542_v62 = vsub.f32 1.0, %v1529_v54  ;;  %v382_v11 = vrot.slane %v1529_v54, %v1510_v38  ;;  %v386_v25 = vrot.slane %v1529_v54, %v1522_v49  ;;  %vm417_vm2 = vcmp.eq.s32.totalorder %v1473_v3, %v412_v15 }
  0x51   :  { %vm419_vm3 = vcmp.eq.s32.totalorder %v1549_v4, %v412_v15  ;;  %1198 = vpow2.f32 %v336_v24  ;;  %vm418_vm5 = vcmp.eq.s32.totalorder %v1473_v3, %v416_v26  ;;  %vm420_vm7 = vcmp.eq.s32.totalorder %v1549_v4, %v416_v26 }
  0x52   :  { %v425_v18 = vrot.slane %v1542_v62, %v1510_v38  ;;  %v392_v27 = vrot.slane %v382_v11, %v1510_v38  ;;  %v429_v28 = vrot.slane %v1542_v62, %v1522_v49  ;;  %v396_v35 = vrot.slane %v386_v25, %v1510_v38 }
  0x53   :  { %v297_v56 = vunpack.c.l.s4 %v1390_v55  ;;  %v488_v58 = vmul.f32 1.442695, %v484_v44  ;;  %v626_v59 = vmax.f32 %v295_v32, 0.0  ;;  %v492_v1 = vmul.f32 1.442695, %v486_v46 }
  0x54   :  { %v435_v29 = vrot.slane %v425_v18, %v1510_v38  ;;  %v397_v36 = vsel %vm374_vm0, %v392_v27, 0.0  ;;  %v399_v37 = vsel %vm376_vm1, %v392_v27, 0.0  ;;  %v439_v40 = vrot.slane %v429_v28, %v1510_v38 }
  0x55   :  { %v398_v57 = vsel %vm375_vm4, %v396_v35, 0.0  ;;  %v1193_v2 = vpop.eup %1192  ;;  %v400_v5 = vsel %vm377_vm6, %v396_v35, 0.0  ;;  %v490_v15 = vmul.f32 1.442695, %v485_v45  ;;  %v640_v18 = vmax.f32 %v1594_v48, %v1596_v50 }
  0x56   :  { %v440_v41 = vsel %vm417_vm2, %v435_v29, 0.0  ;;  %v442_v42 = vsel %vm419_vm3, %v435_v29, 0.0  ;;  %v441_v60 = vsel %vm418_vm5, %v439_v40, 0.0  ;;  %v443_v11 = vsel %vm420_vm7, %v439_v40, 0.0 }
  0x57   :  { %v444_v61 = vadd.f32 %v440_v41, %v397_v36  ;;  %v446_v63 = vadd.f32 %v442_v42, %v399_v37  ;;  %v1195_v19 = vpop.eup %1194  ;;  %v494_v20 = vmul.f32 1.442695, %v487_v52  ;;  %v1611_v21 = vsub.s32 1, %v1473_v3 }
  0x58   :  { %v1614_v22 = vsub.s32 3, %v1473_v3  ;;  %v634_v23 = vrot.slane %v633_v53, 4  ;;  %v298_v24 = vunpack.c.0.s8 %v297_v56  ;;  %v445_v25 = vadd.f32 %v441_v60, %v398_v57 }
  0x59   :  { %1200 = vpow2.f32 %v488_v58  ;;  %v1616_v26 = vmin.f32 %v626_v59, 14.99  ;;  %v1197_v27 = vpop.eup %1196  ;;  %v447_v28 = vadd.f32 %v443_v11, %v400_v5  ;;  %v448_v29 = vmul.f32 %v444_v61, %v1483_v8 }
  0x5a   :  { %v450_v32 = vmul.f32 %v446_v63, %v1487_v10  ;;  %1202 = vpow2.f32 %v492_v1  ;;  %v641_v36 = vrot.slane %v640_v18, 4  ;;  %v519_v37 = vrot.slane %v1512_v39, %v1611_v21 }
  0x5b   :  { %v1199_v35 = vpop.eup %1198  ;;  %1204 = vpow2.f32 %v490_v15  ;;  %v523_v40 = vrot.slane %v1512_v39, %v1614_v22  ;;  %v635_v41 = vmax.f32 %v633_v53, %v634_v23  ;;  %v1625_v42 = vsub.s32 %v298_v24, %v1473_v3 }
  0x5c   :  { %1206 = vpow2.f32 %v494_v20  ;;  %v338_v44 = vadd.f32 %v1197_v27, %v1193_v2  ;;  %v449_v8 = vmul.f32 %v445_v25, %v1485_v9  ;;  %v451_v10 = vmul.f32 %v447_v28, %v1490_v12 }
  0x5d   :  { %v452_v45 = vadd.f32 %v450_v32, %v448_v29  ;;  %v1169_v46 = vtrunc.f32 %v1616_v26  ;;  %v345_v52 = vadd.f32 %v1199_v35, %v1195_v19  ;;  %v539_v55 = vrot.slane %v1529_v54, %v1611_v21 }
  0x5e   :  { %v642_v56 = vmax.f32 %v640_v18, %v641_v36  ;;  %v1633_v57 = vsub.s32 6, %v1473_v3  ;;  %v527_v39 = vrot.slane %v519_v37, %v1611_v21  ;;  %v531_v53 = vrot.slane %v523_v40, %v1611_v21 }
  0x5f   :  { %v561_v9 = vrot.slane %v1515_v43, %v1611_v21  ;;  %v636_v58 = vrot.slane %v635_v41, 2  ;;  %v302_v12 = vrot.slane %v1481_v7, %v1625_v42  ;;  %v339_v59 = vrot.slane %v338_v44, 4 }
  0x60   :  { %v543_v60 = vrot.slane %v1529_v54, %v1614_v22  ;;  %v1644_v61 = vsub.s32 7, %v1473_v3  ;;  %v453_v63 = vrot.slane %v452_v45, 4  ;;  %v459_v1 = vadd.f32 %v451_v10, %v449_v8 }
  0x61   :  { %v565_v2 = vrot.slane %v1515_v43, %v1614_v22  ;;  %v1648_v5 = vcvt.f32.s32 %v1169_v46  ;;  %v346_v15 = vrot.slane %v345_v52, 4  ;;  %v549_v18 = vrot.slane %v539_v55, %v1611_v21 }
  0x62   :  { %v581_v19 = vrot.slane %v1542_v62, %v1611_v21  ;;  %v643_v20 = vrot.slane %v642_v56, 2  ;;  %vm532_vm8 = vcmp.eq.s32.totalorder %v1473_v3, %v527_v39  ;;  %vm533_vm9 = vcmp.eq.s32.totalorder %v1473_v3, %v531_v53 }
  0x63   :  { %v1201_v11 = vpop.eup %1200  ;;  %v569_v54 = vrot.slane %v561_v9, %v1611_v21  ;;  %v637_v24 = vmax.f32 %v635_v41, %v636_v58  ;;  %v340_v43 = vadd.f32 %v339_v59, %v338_v44  ;;  %vm534_vm10 = vcmp.eq.s32.totalorder %v1549_v4, %v527_v39 }
  0x64   :  { %v1203_v23 = vpop.eup %1202  ;;  %v553_v27 = vrot.slane %v543_v60, %v1611_v21  ;;  %v585_v28 = vrot.slane %v1542_v62, %v1614_v22  ;;  %v1660_v32 = vadd.f32 %v453_v63, %v452_v45  ;;  %v460_v35 = vrot.slane %v459_v1, 4 }
  0x65   :  { %v1205_v25 = vpop.eup %1204  ;;  %vm535_vm11 = vcmp.eq.s32.totalorder %v1549_v4, %v531_v53  ;;  %v573_v36 = vrot.slane %v565_v2, %v1611_v21  ;;  %v347_v37 = vadd.f32 %v346_v15, %v345_v52  ;;  %v496_v40 = vadd.f32 %v1203_v23, %v1201_v11 }
  0x66   :  { %v1207_v29 = vpop.eup %1206  ;;  %v554_v41 = vsel %vm532_vm8, %v549_v18, 0.0  ;;  %v591_v44 = vrot.slane %v581_v19, %v1611_v21  ;;  %v556_v8 = vsel %vm534_vm10, %v549_v18, 0.0  ;;  %vm574_vm12 = vcmp.eq.s32.totalorder %v1473_v3, %v569_v54 }
  0x67   :  { %vm576_vm13 = vcmp.eq.s32.totalorder %v1549_v4, %v569_v54  ;;  %v638_v62 = vrot.slane %v637_v24, 1  ;;  %v341_v10 = vrot.slane %v340_v43, 2  ;;  %v503_v45 = vadd.f32 %v1207_v29, %v1205_v25 }
  0x68   :  { %v555_v46 = vsel %vm533_vm9, %v553_v27, 0.0  ;;  %v595_v55 = vrot.slane %v585_v28, %v1611_v21  ;;  %vm575_vm14 = vcmp.eq.s32.totalorder %v1473_v3, %v573_v36  ;;  %vm577_vm15 = vcmp.eq.s32.totalorder %v1549_v4, %v573_v36 }
  0x69   :  { %v1674_v52 = vmax.f32 %v637_v24, %v638_v62  ;;  %v644_v39 = vmax.f32 %v642_v56, %v643_v20  ;;  %v348_v9 = vrot.slane %v347_v37, 2  ;;  %v497_v58 = vrot.slane %v496_v40, 4 }
  0x6a   :  { %v596_v59 = vsel %vm574_vm12, %v591_v44, 0.0  ;;  %v598_v60 = vsel %vm576_vm13, %v591_v44, 0.0  ;;  %v557_v63 = vsel %vm535_vm11, %v553_v27, 0.0  ;;  %v1679_v2 = vadd.s32 1, %v1648_v5 }
  0x6b   :  { %v645_v11 = vrot.slane %v644_v39, 1  ;;  %v647_v15 = vsub.f32 %v1574_v33, %v1674_v52  ;;  %v342_v18 = vadd.f32 %v341_v10, %v340_v43  ;;  %v504_v19 = vrot.slane %v503_v45, 4 }
  0x6c   :  { %v597_v23 = vsel %vm575_vm14, %v595_v55, 0.0  ;;  %v599_v54 = vsel %vm577_vm15, %v595_v55, 0.0  ;;  %v600_v24 = vadd.f32 %v596_v59, %v554_v41  ;;  %v602_v56 = vadd.f32 %v598_v60, %v556_v8 }
  0x6d   :  { %v1683_v20 = vmax.f32 %v644_v39, %v645_v11  ;;  %v649_v25 = vsub.f32 %v1576_v34, %v1674_v52  ;;  %v349_v53 = vadd.f32 %v348_v9, %v347_v37  ;;  %v455_v27 = vrot.slane %v1660_v32, 2 }
  0x6e   :  { %v461_v28 = vadd.f32 %v460_v35, %v459_v1  ;;  %v498_v29 = vadd.f32 %v497_v58, %v496_v40  ;;  %v630_v36 = vcvt.s32.f32 %v1679_v2  ;;  %v651_v41 = vmul.f32 1.442695, %v647_v15 }
  0x6f   :  { %v648_v43 = vsub.f32 %v1594_v48, %v1683_v20  ;;  %v650_v44 = vsub.f32 %v1596_v50, %v1683_v20  ;;  %v343_v8 = vrot.slane %v342_v18, 1  ;;  %v505_v62 = vadd.f32 %v504_v19, %v503_v45 }
  0x70   :  { %v601_v10 = vadd.f32 %v597_v23, %v555_v46  ;;  %v603_v55 = vadd.f32 %v599_v54, %v557_v63  ;;  %v604_v39 = vmul.f32 %v600_v24, %v1492_v13  ;;  %v606_v37 = vmul.f32 %v602_v56, %v1498_v16 }
  0x71   :  { %v653_v9 = vmul.f32 1.442695, %v648_v43  ;;  %v655_v1 = vmul.f32 1.442695, %v649_v25  ;;  %v304_v35 = vsub.f32 %v1476_v6, %v302_v12  ;;  %v499_v40 = vrot.slane %v498_v29, 2 }
  0x72   :  { %v657_v58 = vmul.f32 1.442695, %v650_v44  ;;  %v2044_v59 = vrot.slane %v1476_v6, 6  ;;  %v350_v60 = vrot.slane %v349_v53, 1  ;;  %v462_v11 = vrot.slane %v461_v28, 2 }
  0x73   :  { %v631_v45 = vsub.f32 %v630_v36, %v1616_v26  ;;  %1208 = vpow2.f32 %v651_v41  ;;  %v506_v46 = vrot.slane %v505_v62, 2  ;;  %v605_v13 = vmul.f32 %v601_v10, %v1494_v14 }
  0x74   :  { %v607_v16 = vmul.f32 %v603_v55, %v1500_v17  ;;  %1210 = vpow2.f32 %v653_v9  ;;  %v344_v63 = vadd.f32 %v343_v8, %v342_v18  ;;  %v1704_v7 = vadd.f32 %v455_v27, %v1660_v32  ;;  %v1717_v32 = vld [vmem:[#allocation2 + $0x60] sm:$0xff]  ;;  %v1719_v18 = vld [vmem:[#allocation2 + $0x70] sm:$0xff] }
  0x75   :  { %v608_v42 = vadd.f32 %v606_v37, %v604_v39  ;;  %1212 = vpow2.f32 %v655_v1  ;;  %v500_v12 = vadd.f32 %v499_v40, %v498_v29  ;;  %v682_v15 = vrot.slane %v1648_v5, %v1522_v49 }
  0x76   :  { %1214 = vpow2.f32 %v657_v58  ;;  %v686_v26 = vrot.slane %v1648_v5, %v1633_v57  ;;  %v351_v19 = vadd.f32 %v350_v60, %v349_v53  ;;  %v1710_v23 = vadd.f32 %v462_v11, %v461_v28 }
  0x77   :  { %v632_v14 = vsub.f32 1.0, %v631_v45  ;;  %v1715_v17 = vsub.f32 %v1476_v6, %v2044_v59  ;;  %v1721_v54 = vadd.f32 %v506_v46, %v505_v62  ;;  %v1723_v24 = vadd.f32 %v607_v16, %v605_v13 }
  0x78   :  { %v725_v5 = vrot.slane %v1679_v2, %v1522_v49  ;;  %v791_v56 = vmax.f32 %v304_v35, 0.0  ;;  %v457_v25 = vrot.slane %v1704_v7, 1  ;;  %v609_v53 = vrot.slane %v608_v42, 4 }
  0x79   :  { %v703_v27 = vrot.slane %v631_v45, %v1522_v49  ;;  %v729_v28 = vrot.slane %v1679_v2, %v1633_v57  ;;  %1216 = vlog2.f32 %v344_v63  ;;  %v501_v29 = vrot.slane %v500_v12, 1  ;;  %v1756_v63 = vld [vmem:[#allocation2 + $0x68] sm:$0xff] }
  0x7a   :  { %v690_v36 = vrot.slane %v682_v15, %v1522_v49  ;;  %v694_v43 = vrot.slane %v686_v26, %v1522_v49  ;;  %1218 = vlog2.f32 %v351_v19  ;;  %v746_v44 = vrot.slane %v632_v14, %v1522_v49 }
  0x7b   :  { %v1734_v41 = vmin.f32 %v791_v56, 14.99  ;;  %v798_v8 = vmax.f32 %v1717_v32, %v1719_v18  ;;  %v508_v62 = vrot.slane %v1721_v54, 1  ;;  %v616_v10 = vrot.slane %v1723_v24, 4 }
  0x7c   :  { %v707_v2 = vrot.slane %v631_v45, %v1633_v57  ;;  %v733_v55 = vrot.slane %v725_v5, %v1522_v49  ;;  %v1742_v37 = vadd.f32 %v609_v53, %v608_v42  ;;  %v713_v9 = vrot.slane %v703_v27, %v1522_v49  ;;  %v1758_v42 = vld [vmem:[#allocation2 + $0x78] sm:$0xff] }
  0x7d   :  { %v1209_v39 = vpop.eup %1208  ;;  %v737_v1 = vrot.slane %v729_v28, %v1522_v49  ;;  %v750_v35 = vrot.slane %v632_v14, %v1633_v57  ;;  %v502_v58 = vadd.f32 %v501_v29, %v500_v12  ;;  %vm695_vm0 = vcmp.eq.s32.totalorder %v1473_v3, %v690_v36 }
  0x7e   :  { %v1211_v40 = vpop.eup %1210  ;;  %vm696_vm1 = vcmp.eq.s32.totalorder %v1473_v3, %v694_v43  ;;  %vm697_vm2 = vcmp.eq.s32.totalorder %v1549_v4, %v690_v36  ;;  %vm698_vm3 = vcmp.eq.s32.totalorder %v1549_v4, %v694_v43  ;;  %v756_v11 = vrot.slane %v746_v44, %v1522_v49 }
  0x7f   :  { %v1213_v60 = vpop.eup %1212  ;;  %v1171_v45 = vtrunc.f32 %v1734_v41  ;;  %v799_v46 = vrot.slane %v798_v8, 4  ;;  %v717_v57 = vrot.slane %v707_v2, %v1522_v49  ;;  %vm738_vm4 = vcmp.eq.s32.totalorder %v1473_v3, %v733_v55 }
  0x80   :  { %v1215_v13 = vpop.eup %1214  ;;  %v659_v16 = vadd.f32 %v1213_v60, %v1209_v39  ;;  %vm740_vm5 = vcmp.eq.s32.totalorder %v1549_v4, %v733_v55  ;;  %v718_v15 = vsel %vm695_vm0, %v713_v9, 0.0  ;;  %vm739_vm6 = vcmp.eq.s32.totalorder %v1473_v3, %v737_v1 }
  0x81   :  { %v666_v12 = vadd.f32 %v1215_v13, %v1211_v40  ;;  %v760_v26 = vrot.slane %v750_v35, %v1522_v49  ;;  %vm741_vm7 = vcmp.eq.s32.totalorder %v1549_v4, %v737_v1  ;;  %v1172_v14 = vcvt.f32.s32 %v1171_v45 }
  0x82   :  { %v660_v19 = vrot.slane %v659_v16, 4  ;;  %v800_v5 = vmax.f32 %v798_v8, %v799_v46  ;;  %v720_v53 = vsel %vm697_vm2, %v713_v9, 0.0  ;;  %v761_v27 = vsel %vm738_vm4, %v756_v11, 0.0 }
  0x83   :  { %v667_v56 = vrot.slane %v666_v12, 4  ;;  %v763_v28 = vsel %vm740_vm5, %v756_v11, 0.0  ;;  %v1767_v29 = vpop.eup %1216  ;;  %v1769_v2 = vadd.s32 1, %v1172_v14  ;;  %v805_v49 = vmax.f32 %v1756_v63, %v1758_v42 }
  0x84   :  { %v661_v44 = vadd.f32 %v660_v19, %v659_v16  ;;  %v801_v55 = vrot.slane %v800_v5, 2  ;;  %v1773_v39 = vpop.eup %1218  ;;  %v719_v8 = vsel %vm696_vm1, %v717_v57, 0.0  ;;  %v721_v36 = vsel %vm698_vm3, %v717_v57, 0.0 }
  0x85   :  { %v762_v9 = vsel %vm739_vm6, %v760_v26, 0.0  ;;  %v764_v35 = vsel %vm741_vm7, %v760_v26, 0.0  ;;  %v765_v40 = vadd.f32 %v761_v27, %v718_v15  ;;  %v795_v60 = vcvt.s32.f32 %v1769_v2 }
  0x86   :  { %v802_v11 = vmax.f32 %v800_v5, %v801_v55  ;;  %v806_v45 = vrot.slane %v805_v49, 4  ;;  %v1785_v46 = vadd.f32 %v616_v10, %v1723_v24  ;;  %v662_v13 = vrot.slane %v661_v44, 2 }
  0x87   :  { %v668_v16 = vadd.f32 %v667_v56, %v666_v12  ;;  %v767_v19 = vadd.f32 %v763_v28, %v720_v53  ;;  %v509_v43 = vadd.f32 %v508_v62, %v1721_v54  ;;  %v847_v59 = vrot.slane %v1172_v14, %v1614_v22 }
  0x88   :  { %v803_v57 = vrot.slane %v802_v11, 1  ;;  %v807_v0 = vmax.f32 %v805_v49, %v806_v45  ;;  %1220 = vlog2.f32 %v502_v58  ;;  %v611_v1 = vrot.slane %v1742_v37, 2 }
  0x89   :  { %v766_v15 = vadd.f32 %v762_v9, %v719_v8  ;;  %v768_v26 = vadd.f32 %v764_v35, %v721_v36  ;;  %v769_v5 = vmul.f32 %v765_v40, %v1574_v33  ;;  %v796_v27 = vsub.f32 %v795_v60, %v1734_v41 }
  0x8a   :  { %v1792_v24 = vmax.f32 %v802_v11, %v803_v57  ;;  %v808_v10 = vrot.slane %v807_v0, 2  ;;  %v1794_v12 = vadd.f32 %v662_v13, %v661_v44  ;;  %v669_v56 = vrot.slane %v668_v16, 2 }
  0x8b   :  { %v771_v54 = vmul.f32 %v767_v19, %v1576_v34  ;;  %v851_v62 = vrot.slane %v1172_v14, %v1644_v61  ;;  %v855_v33 = vrot.slane %v847_v59, %v1614_v22  ;;  %1222 = vlog2.f32 %v509_v43 }
  0x8c   :  { %v809_v53 = vmax.f32 %v807_v0, %v808_v10  ;;  %v812_v58 = vsub.f32 %v1717_v32, %v1792_v24  ;;  %v814_v28 = vsub.f32 %v1719_v18, %v1792_v24  ;;  %v618_v41 = vrot.slane %v1785_v46, 2 }
  0x8d   :  { %v770_v44 = vmul.f32 %v766_v15, %v1594_v48  ;;  %v772_v55 = vmul.f32 %v768_v26, %v1596_v50  ;;  %v797_v49 = vsub.f32 1.0, %v796_v27  ;;  %v664_v0 = vrot.slane %v1794_v12, 1 }
  0x8e   :  { %v810_v34 = vrot.slane %v809_v53, 1  ;;  %v816_v8 = vmul.f32 1.442695, %v812_v58  ;;  %v820_v14 = vmul.f32 1.442695, %v814_v28  ;;  %v670_v36 = vadd.f32 %v669_v56, %v668_v16 }
  0x8f   :  { %v1807_v9 = vadd.f32 %v771_v54, %v769_v5  ;;  %v859_v35 = vrot.slane %v851_v62, %v1614_v22  ;;  %vm860_vm8 = vcmp.eq.s32.totalorder %v1473_v3, %v855_v33  ;;  %vm862_vm9 = vcmp.eq.s32.totalorder %v1549_v4, %v855_v33 }
  0x90   :  { %v1810_v40 = vmax.f32 %v809_v53, %v810_v34  ;;  %1224 = vpow2.f32 %v816_v8  ;;  %v868_v48 = vrot.slane %v796_v27, %v1614_v22  ;;  %v872_v50 = vrot.slane %v796_v27, %v1644_v61 }
  0x91   :  { %1226 = vpow2.f32 %v820_v14  ;;  %v890_v59 = vrot.slane %v1769_v2, %v1614_v22  ;;  %v894_v45 = vrot.slane %v1769_v2, %v1644_v61  ;;  %v911_v13 = vrot.slane %v797_v49, %v1614_v22 }
  0x92   :  { %v813_v60 = vsub.f32 %v1756_v63, %v1810_v40  ;;  %v815_v11 = vsub.f32 %v1758_v42, %v1810_v40  ;;  %v1825_v16 = vpop.eup %1220  ;;  %v878_v19 = vrot.slane %v868_v48, %v1614_v22  ;;  %v882_v43 = vrot.slane %v872_v50, %v1614_v22 }
  0x93   :  { %v898_v57 = vrot.slane %v890_v59, %v1614_v22  ;;  %v915_v15 = vrot.slane %v797_v49, %v1644_v61  ;;  %v902_v27 = vrot.slane %v894_v45, %v1614_v22  ;;  %v921_v10 = vrot.slane %v911_v13, %v1614_v22  ;;  %v1846_v49 = vld [vmem:[#allocation5] sm:$0xff] }
  0x94   :  { %v818_v26 = vmul.f32 1.442695, %v813_v60  ;;  %v822_v5 = vmul.f32 1.442695, %v815_v11  ;;  %vm861_vm10 = vcmp.eq.s32.totalorder %v1473_v3, %v859_v35  ;;  %vm863_vm11 = vcmp.eq.s32.totalorder %v1549_v4, %v859_v35 }
  0x95   :  { %v883_v2 = vsel %vm860_vm8, %v878_v19, 0.0  ;;  %v885_v56 = vsel %vm862_vm9, %v878_v19, 0.0  ;;  %vm903_vm12 = vcmp.eq.s32.totalorder %v1473_v3, %v898_v57  ;;  %vm904_vm13 = vcmp.eq.s32.totalorder %v1473_v3, %v902_v27  ;;  %v1842_v61 = vpop.eup %1222 }
  0x96   :  { %1228 = vpow2.f32 %v818_v26  ;;  %vm905_vm14 = vcmp.eq.s32.totalorder %v1549_v4, %v898_v57  ;;  %vm906_vm15 = vcmp.eq.s32.totalorder %v1549_v4, %v902_v27  ;;  %v925_v54 = vrot.slane %v915_v15, %v1614_v22 }
  0x97   :  { %1230 = vpow2.f32 %v822_v5  ;;  %v926_v62 = vsel %vm903_vm12, %v921_v10, 0.0  ;;  %v884_v53 = vsel %vm861_vm10, %v882_v43, 0.0  ;;  %v886_v58 = vsel %vm863_vm11, %v882_v43, 0.0 }
  0x98   :  { %v928_v28 = vsel %vm905_vm14, %v921_v10, 0.0  ;;  %v930_v33 = vadd.f32 %v926_v62, %v883_v2  ;;  %v671_v34 = vrot.slane %v670_v36, 1  ;;  %v927_v8 = vsel %vm904_vm13, %v925_v54, 0.0 }
  0x99   :  { %v929_v14 = vsel %vm906_vm15, %v925_v54, 0.0  ;;  %v932_v35 = vadd.f32 %v928_v28, %v885_v56  ;;  %v665_v50 = vadd.f32 %v664_v0, %v1794_v12  ;;  %v774_v59 = vrot.slane %v1807_v9, 4 }
  0x9a   :  { %v1225_v48 = vpop.eup %1224  ;;  %v780_v60 = vadd.f32 %v772_v55, %v770_v44  ;;  %v934_v4 = vmul.f32 %v930_v33, %v1717_v32  ;;  %v931_v11 = vadd.f32 %v927_v8, %v884_v53  ;;  %v933_v45 = vadd.f32 %v929_v14, %v886_v58 }
  0x9b   :  { %v1227_v22 = vpop.eup %1226  ;;  %v936_v13 = vmul.f32 %v932_v35, %v1719_v18  ;;  %v67_v19 = vrot.slane %v1846_v49, 6  ;;  %v353_v43 = vmul.f32 0.6931472, %v1767_v29  ;;  %v355_v57 = vmul.f32 0.6931472, %v1773_v39 }
  0x9c   :  { %v464_v15 = vrot.slane %v1710_v23, 1  ;;  %v824_v26 = vadd.f32 %v1227_v22, %v1225_v48  ;;  %v612_v12 = vadd.f32 %v611_v1, %v1742_v37  ;;  %v672_v44 = vadd.f32 %v671_v34, %v670_v36 }
  0x9d   :  { %v938_v32 = vadd.f32 %v936_v13, %v934_v4  ;;  %v1860_v55 = vsub.f32 %v1846_v49, %v67_v19  ;;  %1232 = vlog2.f32 %v665_v50  ;;  %v775_v18 = vadd.f32 %v774_v59, %v1807_v9 }
  0x9e   :  { %v781_v0 = vrot.slane %v780_v60, 4  ;;  %v825_v5 = vrot.slane %v824_v26, 4  ;;  %v619_v29 = vadd.f32 %v618_v41, %v1785_v46  ;;  %v935_v39 = vmul.f32 %v931_v11, %v1756_v63 }
  0x9f   :  { %v937_v27 = vmul.f32 %v933_v45, %v1758_v42  ;;  %v75_v37 = vadd.f32 1e-07, %v1715_v17  ;;  %v1872_v36 = vadd.f32 %v457_v25, %v1704_v7  ;;  %v1875_v9 = vadd.f32 %v464_v15, %v1710_v23 }
  0xa0   :  { %v1229_v1 = vpop.eup %1228  ;;  %v826_v10 = vadd.f32 %v825_v5, %v824_v26  ;;  %v70_v2 = vadd.f32 1e-07, %v1860_v55  ;;  %v1879_v46 = vadd.f32 %v353_v43, %v1517_v47  ;;  %v613_v63 = vrot.slane %v612_v12, 1 }
  0xa1   :  { %v1231_v56 = vpop.eup %1230  ;;  %1234 = vlog2.f32 %v672_v44  ;;  %v939_v42 = vrot.slane %v938_v32, 4  ;;  %v776_v41 = vrot.slane %v775_v18, 2  ;;  %v782_v54 = vadd.f32 %v781_v0, %v780_v60 }
  0xa2   :  { %v827_v62 = vrot.slane %v826_v10, 2  ;;  %v831_v53 = vadd.f32 %v1231_v56, %v1229_v1  ;;  %v1882_v7 = vadd.f32 %v355_v57, %v1525_v51  ;;  %v620_v25 = vrot.slane %v619_v29, 1 }
  0xa3   :  { %v945_v23 = vadd.f32 %v937_v27, %v935_v39  ;;  %v94_v58 = vrot.slane %v75_v37, 5  ;;  %v511_v28 = vmul.f32 0.6931472, %v1825_v16  ;;  %v89_v8 = vrot.slane %v70_v2, 5 }
  0xa4   :  { %v828_v33 = vadd.f32 %v827_v62, %v826_v10  ;;  %v832_v34 = vrot.slane %v831_v53, 4  ;;  %v466_v47 = vsub.f32 %v1879_v46, %v1872_v36  ;;  %v513_v14 = vmul.f32 0.6931472, %v1842_v61 }
  0xa5   :  { %v614_v35 = vadd.f32 %v613_v63, %v612_v12  ;;  %v940_v48 = vadd.f32 %v939_v42, %v938_v32  ;;  %v777_v50 = vadd.f32 %v776_v41, %v775_v18  ;;  %v783_v59 = vrot.slane %v782_v54, 2 }
  0xa6   :  { %v829_v60 = vrot.slane %v828_v33, 1  ;;  %v833_v51 = vadd.f32 %v832_v34, %v831_v53  ;;  %v621_v4 = vadd.f32 %v620_v25, %v619_v29  ;;  %v946_v22 = vrot.slane %v945_v23, 4 }
  0xa7   :  { %v1888_v11 = vrot.slane %v94_v58, 4  ;;  %v2045_v16 = vrot.slane %v1476_v6, 6  ;;  %v1233_v13 = vpop.eup %1232  ;;  %v514_v43 = vadd.f32 %v511_v28, %v1568_v30  ;;  %v1893_v26 = vrot.slane %v89_v8, 4 }
  0xa8   :  { %v830_v57 = vadd.f32 %v829_v60, %v828_v33  ;;  %v834_v15 = vrot.slane %v833_v51, 2  ;;  %v515_v61 = vadd.f32 %v513_v14, %v1570_v31  ;;  %v941_v12 = vrot.slane %v940_v48, 2 }
  0xa9   :  { %v114_v45 = vrot.slane %v2045_v16, 4  ;;  %v118_v32 = vrot.slane %v67_v19, 4  ;;  %v778_v18 = vrot.slane %v777_v50, 1  ;;  %v784_v0 = vadd.f32 %v783_v59, %v782_v54 }
  0xaa   :  { %v835_v5 = vadd.f32 %v834_v15, %v833_v51  ;;  %1236 = vlog2.f32 %v830_v57  ;;  %v674_v39 = vmul.f32 0.6931472, %v1233_v13  ;;  %v947_v27 = vadd.f32 %v946_v22, %v945_v23 }
  0xab   :  { %v116_v44 = vadd.f32 %v114_v45, %v1476_v6  ;;  %v1235_v29 = vpop.eup %1234  ;;  %1238 = vrcp.f32 %v1888_v11  ;;  %v467_v30 = vsub.f32 %v1882_v7, %v1875_v9  ;;  %v622_v1 = vsub.f32 %v514_v43, %v614_v35 }
  0xac   :  { %v836_v31 = vrot.slane %v835_v5, 1  ;;  %1240 = vrcp.f32 %v1893_v26  ;;  %v623_v6 = vsub.f32 %v515_v61, %v621_v4  ;;  %v942_v19 = vadd.f32 %v941_v12, %v940_v48  ;;  %v1264_v4 = vld [vmem:[#allocation7] sm:$0xff] }
  0xad   :  { %v117_v37 = vsub.f32 %v116_v44, %v1846_v49  ;;  %1242 = vlog2.f32 %v1715_v17  ;;  %v676_v10 = vmul.f32 0.6931472, %v1235_v29  ;;  %v785_v2 = vrot.slane %v784_v0, 1 }
  0xae   :  { %v837_v56 = vadd.f32 %v836_v31, %v835_v5  ;;  %v195_v46 = vadd.f32 %v118_v32, %v1846_v49  ;;  %v677_v63 = vadd.f32 %v674_v39, %v1674_v52  ;;  %v779_v42 = vadd.f32 %v778_v18, %v777_v50 }
  0xaf   :  { %v1902_v36 = vsub.f32 %v117_v37, %v118_v32  ;;  %v948_v41 = vrot.slane %v947_v27, 2  ;;  %v197_v9 = vmul.f32 0.5, %v116_v44  ;;  %v205_v62 = vsub.f32 %v1860_v55, %v1715_v17 }
  0xb0   :  { %1244 = vlog2.f32 %v837_v56  ;;  %v196_v54 = vmul.f32 0.5, %v195_v46  ;;  %v238_v53 = vmax.f32 %v1860_v55, %v1715_v17  ;;  %v943_v7 = vrot.slane %v942_v19, 1 }
  0xb1   :  { %v678_v25 = vadd.f32 %v676_v10, %v1683_v20  ;;  %v786_v23 = vadd.f32 %v785_v2, %v784_v0  ;;  %v206_v28 = vmul.f32 %v205_v62, %v205_v62  ;;  %v624_v33 = vadd.f32 %v622_v1, %v466_v47 }
  0xb2   :  { %v198_v58 = vsub.f32 %v196_v54, %v197_v9  ;;  %v787_v34 = vsub.f32 %v677_v63, %v779_v42  ;;  %v949_v52 = vadd.f32 %v948_v41, %v947_v27  ;;  %v239_v8 = vadd.f32 1e-07, %v238_v53 }
  0xb3   :  { %v625_v35 = vadd.f32 %v623_v6, %v467_v30  ;;  %v1162_v50 = vrot.slane %v206_v28, 9  ;;  %v944_v51 = vadd.f32 %v943_v7, %v942_v19  ;;  %v1913_v22 = vmax.f32 %v1846_v49, %v1264_v4 }
  0xb4   :  { %v1237_v14 = vpop.eup %1236  ;;  %v199_v48 = vmul.f32 %v198_v58, %v198_v58  ;;  %1246 = vrcp.f32 %v239_v8  ;;  %v788_v16 = vsub.f32 %v678_v25, %v786_v23  ;;  %v789_v57 = vadd.f32 %v787_v34, %v624_v33 }
  0xb5   :  { %v1239_v59 = vpop.eup %1238  ;;  %v839_v60 = vmul.f32 0.6931472, %v1237_v14  ;;  %v211_v13 = vadd.f32 %v1162_v50, %v206_v28  ;;  %v950_v61 = vrot.slane %v949_v52, 1  ;;  %v1923_v44 = vmin.f32 %v1846_v49, %v1264_v4 }
  0xb6   :  { %v1241_v20 = vpop.eup %1240  ;;  %v1916_v45 = vmul.f32 %v1239_v59, %v1715_v17  ;;  %v1161_v47 = vrot.slane %v199_v48, 9  ;;  %v79_v29 = vrot.slane %v1913_v22, 6  ;;  %v1391_v49 = vmov 1966171168  }
  0xb7   :  { %v1243_v43 = vpop.eup %1242  ;;  %v842_v15 = vadd.f32 %v839_v60, %v1792_v24  ;;  %v1920_v12 = vmul.f32 %v1241_v20, %v1860_v55  ;;  %v212_v0 = vmul.f32 0.8, %v211_v13  ;;  %v951_v1 = vadd.f32 %v950_v61, %v949_v52  ;;  %v1952_v52 = vld [vmem:[%s2040_s4] sm:$0x3]  ;;  %s1392_s4 = smov [#allocation8]  }
  0xb8   :  { %v1926_v32 = vand.u32 2147483647, %v1916_v45  ;;  %v204_v18 = vadd.f32 %v1161_v47, %v199_v48  ;;  %v219_v27 = vmul.f32 0.6931472, %v1243_v43  ;;  %v960_v31 = vunpack.c.l.s4 %v1391_v49  ;;  %s1132_s11 = sshll.u32 %s1392_s4, 4  ;;  %s1133_s11 = int_to_ptr.vmem [resolvable:$true] %s1132_s11 }
  0xb9   :  { %v952_v5 = vsub.f32 %v842_v15, %v944_v51  ;;  %v1930_v39 = vand.u32 2147483647, %v1920_v12  ;;  %v1163_v37 = vrot.slane %v212_v0, 10  ;;  %v237_v10 = vand.u32 2147483647, %v205_v62  ;;  %s1331_s12 = scalar_lea.vmem %s1133_s11, 32  ;;  %p1336_p11 = scmp.lt.s32.totalorder %s1133_s11, %s1133_s11 }
  0xba   :  { %v1245_v24 = vpop.eup %1244  ;;  %1248 = vrcp.f32 %v1926_v32  ;;  %v220_v19 = vmul.f32 1.2, %v219_v27  ;;  %v790_v2 = vadd.f32 %v788_v16, %v625_v35  ;;  %v81_v63 = vsub.f32 %v1923_v44, %v79_v29  ;;  %p1332_p10 = scmp.ne.s32.totalorder %s1133_s11, %s1331_s12  ;;  %p1337_p12 = scmp.lt.s32.totalorder %s1331_s12, %s1331_s12 }
  0xbb   :  { %v841_v30 = vmul.f32 0.6931472, %v1245_v24  ;;  %1250 = vrcp.f32 %v1930_v39  ;;  %v1934_v6 = vadd.f32 %v1163_v37, %v204_v18  ;;  %v954_v46 = vadd.f32 %v952_v5, %v789_v57 }
  0xbc   :  { %v221_v42 = vmul.f32 1.442695, %v220_v19  ;;  %v961_v54 = vunpack.c.0.s8 %v960_v31  ;;  %v82_v23 = vmax.f32 %v81_v63, 0.0  ;;  %vm131_vm0 = vcmp.gt.f32.partialorder %v1926_v32, 1.0  ;;  %p1338_p13 = por %p1337_p12, %p1336_p11 }
  0xbd   :  { %v843_v56 = vadd.f32 %v841_v30, %v1810_v40  ;;  %v956_v25 = vmul.f32 0.25, %v954_v46  ;;  %vm153_vm1 = vcmp.gt.f32.partialorder %v1930_v39, 1.0  ;;  %v92_v28 = vmul.f32 %v1893_v26, %v1860_v55 }
  0xbe   :  { %v1247_v41 = vpop.eup %1246  ;;  %1252 = vpow2.f32 %v221_v42  ;;  %v1942_v62 = vsub.s32 %v961_v54, %v1473_v3  ;;  %v97_v33 = vmul.f32 %v1888_v11, %v1715_v17  ;;  %v1156_v14 = vrot.slane %v82_v23, 9  ;;  %p1339_p0 = pnand %p1338_p13, %p1332_p10 }
  0xbf   :  { %v953_v9 = vsub.f32 %v843_v56, %v951_v1  ;;  %v1938_v53 = vmul.f32 %v1247_v41, %v237_v10  ;;  %vm65_vm2 = vcmp.gt.f32.partialorder %v1952_v52, 0.0  ;;  %v1103_v4 = vrot.slane %v1952_v52, %v1510_v38 }
  0xc0   :  { %v98_v11 = vadd.f32 %v97_v33, %v92_v28  ;;  %v1963_v60 = vmul.f32 %v1156_v14, %v82_v23  ;;  %v1107_v47 = vrot.slane %v1952_v52, %v1611_v21  ;;  %vm1029_vm3 = vcmask 1040384  }
  0xc1   :  { %v955_v7 = vadd.f32 %v953_v9, %v790_v2  ;;  %v104_v18 = vrot.slane %v1923_v44, 6  ;;  %v1110_v27 = vsel %vm1029_vm3, %v1103_v4, 0.0  ;;  %vm147_vm4 = vcmp.lt.f32.partialorder %v1916_v45, 0.0 }
  0xc2   :  { %v99_v5 = vsub.f32 %v98_v11, %v1963_v60  ;;  %v1111_v49 = vsel %vm1029_vm3, %v1107_v47, 0.0  ;;  %vm169_vm5 = vcmp.lt.f32.partialorder %v1920_v12, 0.0 }
  0xc3   :  { %v957_v58 = vmul.f32 0.25, %v955_v7  ;;  %v1112_v56 = vadd.f32 %v1111_v49, %v1110_v27  ;;  %v106_v42 = vsub.f32 %v1913_v22, %v104_v18 }
  0xc4   :  { %v1249_v40 = vpop.eup %1248  ;;  %v100_v63 = vadd.f32 1e-07, %v99_v5  ;;  %v121_v5 = vmul.f32 %v1902_v36, %v1902_v36 }
  0xc5   :  { %v1251_v34 = vpop.eup %1250  ;;  %v995_v8 = vcombine.low %v956_v25, %v957_v58  ;;  %v134_v35 = vsel %vm131_vm0, %v1249_v40, %v1926_v32  ;;  %v107_v25 = vmul.f32 %v106_v42, %v106_v42 }
  0xc6   :  { %v135_v48 = vmul.f32 %v134_v35, %v134_v35  ;;  %v156_v55 = vsel %vm153_vm1, %v1251_v34, %v1930_v39 }
  0xc7   :  { %v1002_v26 = vrot.slane %v995_v8, %v1942_v62  ;;  %v157_v17 = vmul.f32 %v156_v55, %v156_v55  ;;  %v1157_v33 = vrot.slane %v107_v25, 9 }
  0xc8   :  { %v136_v50 = vmul.f32 0.0208351, %v135_v48  ;;  %v1253_v20 = vpop.eup %1252 }
  0xc9   :  { %v1009_v59 = vrot.slane %v1002_v26, %v1942_v62  ;;  %v158_v51 = vmul.f32 0.0208351, %v157_v17  ;;  %v1164_v57 = vrot.slane %v1253_v20, 9  ;;  %v229_v8 = vmul.f32 2.0, %v1253_v20 }
  0xca   :  { %v137_v16 = vadd.f32 -0.085133, %v136_v50 }
  0xcb   :  { %v1011_v13 = vsel %vm65_vm2, %v1009_v59, 0.0  ;;  %v159_v43 = vadd.f32 -0.085133, %v158_v51  ;;  %v227_v24 = vadd.f32 %v1253_v20, %v1164_v57 }
  0xcc   :  { %v1076_v15 = vrot.slane %v1011_v13, %v1510_v38  ;;  %v1080_v61 = vrot.slane %v1011_v13, %v1611_v21  ;;  %v138_v0 = vmul.f32 %v137_v16, %v135_v48 }
  0xcd   :  { %v160_v29 = vmul.f32 %v159_v43, %v157_v17  ;;  %v228_v10 = vadd.f32 1e-07, %v227_v24 }
  0xce   :  { %v1083_v37 = vsel %vm1029_vm3, %v1076_v15, 0.0  ;;  %v1084_v30 = vsel %vm1029_vm3, %v1080_v61, 0.0  ;;  %v139_v1 = vadd.f32 0.180141, %v138_v0 }
  0xcf   :  { %v1085_v31 = vadd.f32 %v1084_v30, %v1083_v37  ;;  %v161_v19 = vadd.f32 0.180141, %v160_v29  ;;  %1254 = vrcp.f32 %v228_v10  ;;  %v233_v46 = vrot.slane %v228_v10, 7 }
  0xd0   :  { %v140_v2 = vmul.f32 %v139_v1, %v135_v48  ;;  %v1158_v37 = vrot.slane %v121_v5, 9 }
  0xd1   :  { %1086 = vadd.xlane.f32.xlu1 %v1085_v31  ;;  %v162_v44 = vmul.f32 %v161_v19, %v157_v17  ;;  %1256 = vrcp.f32 %v233_v46 }
  0xd2   :  { %v141_v41 = vadd.f32 -0.3302995, %v140_v2  ;;  %1258 = vrcp.f32 %v100_v63 }
  0xd3   :  { %v163_v9 = vadd.f32 -0.3302995, %v162_v44 }
  0xd4   :  { %v142_v54 = vmul.f32 %v141_v41, %v135_v48  ;;  %v242_v48 = vmin.f32 %v1938_v53, 5.0 }
  0xd5   :  { %v164_v7 = vmul.f32 %v163_v9, %v157_v17  ;;  %1113 = vadd.xlane.f32.xlu1 %v1112_v56 }
  0xd6   :  { %v143_v23 = vadd.f32 0.999866, %v142_v54 }
  0xd7   :  { %v165_v58 = vadd.f32 0.999866, %v164_v7 }
  0xd8   :  { %v144_v40 = vmul.f32 %v143_v23, %v134_v35  ;;  %v112_v35 = vadd.f32 %v1157_v33, %v107_v25 }
  0xd9   :  { %v166_v28 = vmul.f32 %v165_v58, %v156_v55  ;;  %v1255_v14 = vpop.eup %1254 }
  0xda   :  { %v145_v34 = vsub.f32 1.5707964, %v144_v40  ;;  %v231_v11 = vmul.f32 %v1255_v14, %v229_v8  ;;  %v113_v45 = vadd.f32 1e-07, %v112_v35 }
  0xdb   :  { %v167_v26 = vsub.f32 1.5707964, %v166_v28  ;;  %v1257_v17 = vpop.eup %1256 }
  0xdc   :  { %v146_v22 = vsel %vm131_vm0, %v145_v34, %v144_v40  ;;  %v236_v51 = vmul.f32 %v1257_v17, %v229_v8  ;;  %v243_v4 = vmul.f32 %v242_v48, %v231_v11  ;;  %v1259_v16 = vpop.eup %1258  ;;  %v1159_v18 = vrot.slane %v113_v45, 10 }
  0xdd   :  { %v148_v50 = vsub.f32 0.0, %v146_v22  ;;  %v168_v59 = vsel %vm153_vm1, %v167_v26, %v166_v28  ;;  %v102_v53 = vmul.f32 %v1259_v16, %v1963_v60  ;;  %v126_v60 = vadd.f32 %v1158_v37, %v121_v5 }
  0xde   :  { %v170_v55 = vsub.f32 0.0, %v168_v59  ;;  %v245_v47 = vmul.f32 %v242_v48, %v236_v51  ;;  %v244_v43 = vmul.f32 %v243_v4, %v242_v48  ;;  %1260 = vrcp.f32 %v1159_v18 }
  0xdf   :  { %v149_v20 = vsel %vm147_vm4, %v148_v50, %v146_v22  ;;  %v127_v10 = vmul.f32 0.25, %v126_v60  ;;  %v2046_v26 = vlaneseq }
  0xe0   :  { %v171_v32 = vsel %vm169_vm5, %v170_v55, %v168_v59  ;;  %v246_v57 = vmul.f32 %v245_v47, %v242_v48 }
  0xe1   :  { %v172_v13 = vsub.f32 %v149_v20, %v171_v32  ;;  %vm1014_vm6 = vcmp.lt.s32.totalorder %v2046_v26, 256 }
  0xe2   :  { %v1165_v61 = vrot.slane %v246_v57, 9 }
  0xe3   :  { %v173_v15 = vmul.f32 %v172_v13, %v172_v13 }
  0xe4   :  { %v251_v0 = vadd.f32 %v1165_v61, %v244_v43 }
  0xe5   :  { %v174_v39 = vmul.f32 0.40528473, %v173_v15 }
  0xe6   :  { %v252_v29 = vmul.f32 0.3, %v251_v0 }
  0xe7   :  { %v175_v12 = vsub.f32 %v174_v39, %v102_v53 }
  0xe8   :  { %v1166_v24 = vrot.slane %v252_v29, 10  ;;  %v1261_v19 = vpop.eup %1260 }
  0xe9   :  { %v176_v27 = vadd.f32 1.0000001, %v175_v12  ;;  %v184_v44 = vmul.f32 %v1261_v19, %v127_v10 }
  0xea   :  { %v257_v30 = vadd.f32 %v1166_v24, %v1934_v6 }
  0xeb   :  { %1262 = vrcp.f32 %v176_v27 }
  0xec   :  { %v983_v1 = vrot.slane %v257_v30, %v1942_v62 }
  0xee   :  { %v990_v49 = vrot.slane %v983_v1, %v1942_v62 }
  0xf0   :  { %v992_v31 = vsel %vm65_vm2, %v990_v49, 0.0 }
  0xf1   :  { %v1049_v7 = vrot.slane %v992_v31, %v1510_v38  ;;  %v1053_v25 = vrot.slane %v992_v31, %v1611_v21 }
  0xf3   :  { %v1056_v34 = vsel %vm1029_vm3, %v1049_v7, 0.0 }
  0xf5   :  { %v1263_v2 = vpop.eup %1262 }
  0xf6   :  { %v178_v36 = vmul.f32 %v1263_v2, %v174_v39 }
  0xf8   :  { %v185_v56 = vmul.f32 %v178_v36, %v174_v39 }
  0xfa   :  { %v1160_v46 = vrot.slane %v185_v56, 10 }
  0xfc   :  { %v190_v63 = vadd.f32 %v1160_v46, %v184_v44 }
  0xfe   :  { %v192_v42 = vrot.slane %v190_v63, 6 }
 0x100   :  { %v194_v41 = vsub.f32 %v102_v53, %v192_v42 }
 0x102   :  { %v965_v6 = vrot.slane %v194_v41, %v1942_v62 }
 0x104   :  { %v972_v9 = vrot.slane %v965_v6, %v1942_v62  ;;  %v1057_v62 = vsel %vm1029_vm3, %v1053_v25, 0.0 }
 0x105   :  { %v1058_v14 = vadd.f32 %v1057_v62, %v1056_v34 }
 0x106   :  { %v973_v54 = vcombine.high %v972_v9, %v972_v9 }
 0x108   :  { %v975_v23 = vsel %vm65_vm2, %v973_v54, 0.0 }
 0x109   :  { %v1022_v58 = vrot.slane %v975_v23, %v1510_v38  ;;  %v1026_v40 = vrot.slane %v975_v23, %v1611_v21  ;;  %1016 = vst.msk [vmem:[#allocation8] sm:$0x3] %vm1014_vm6, %v975_v23 }
 0x10b   :  { %v1030_v28 = vsel %vm1029_vm3, %v1022_v58, 0.0  ;;  %v1031_v33 = vsel %vm1029_vm3, %v1026_v40, 0.0 }
 0x10c   :  { %v1032_v8 = vadd.f32 %v1031_v33, %v1030_v28 }
 0x10e   :  { %1033 = vadd.xlane.f32.xlu0 %v1032_v8 }
 0x112   :  { %1059 = vadd.xlane.f32.xlu0 %v1058_v14 }
 0x113   :  { %1342 = shalt.err (!%p1339_p0)
}
 0x114   :  { %s1343_s15 = scalar_lea.hbm %s2041_s5, 32 }
 0x115   :  { %p1344_p1 = scmp.ne.s32.totalorder %s2041_s5, %s1343_s15  ;;  %p1347_p2 = scmp.lt.u32.totalorder %s1343_s15, %s2041_s5 }
 0x117   :  { %p1349_p3 = pnand %p1347_p2, %p1344_p1 }
 0x119   :  { %1352 = shalt.err (!%p1349_p3)
}
 0x11a   :  { %1135 = dma.vmem_to_hbm [thread:$0]  %s1133_s11, 32, %s2041_s5, [#allocation4]   ;;  %vm1017_vm7 = vcmp.eq.s32.totalorder %v1473_v3, 0  ;;  %vm1044_vm8 = vcmp.eq.s32.totalorder %v1473_v3, 1  ;;  %vm1071_vm9 = vcmp.eq.s32.totalorder %v1473_v3, 2  ;;  %vm1098_vm10 = vcmp.eq.s32.totalorder %v1473_v3, 3 }
 0x11b   :  { %s1393_s25 = smov [#allocation9]  }
 0x11c   :  { %s1142_s26 = sshll.u32 %s1393_s25, 4  ;;  %s1143_s26 = int_to_ptr.vmem [resolvable:$true] %s1142_s26 }
 0x11d   :  { %s1353_s27 = scalar_lea.vmem %s1143_s26, 128  ;;  %p1358_p5 = scmp.lt.s32.totalorder %s1143_s26, %s1143_s26 }
 0x11e   :  { %p1354_p4 = scmp.ne.s32.totalorder %s1143_s26, %s1353_s27  ;;  %p1359_p6 = scmp.lt.s32.totalorder %s1353_s27, %s1353_s27 }
 0x120   :  { %p1360_p7 = por %p1359_p6, %p1358_p5 }
 0x122   :  { %p1361_p8 = pnand %p1360_p7, %p1354_p4 }
 0x15e   :  { %v1087_v38 = vpop.xlane.xlu1 %1086 }
 0x15f   :  { %v1088_v52 = vrot.slane %v1087_v38, 4 }
 0x161   :  { %v1089_v11 = vadd.f32 %v1088_v52, %v1087_v38 }
 0x162   :  { %v1114_v21 = vpop.xlane.xlu1 %1113 }
 0x163   :  { %v1115_v22 = vrot.slane %v1114_v21, 4  ;;  %v1090_v35 = vrot.slane %v1089_v11, 2 }
 0x165   :  { %v1116_v50 = vadd.f32 %v1115_v22, %v1114_v21  ;;  %v1091_v47 = vadd.f32 %v1090_v35, %v1089_v11 }
 0x167   :  { %v1117_v4 = vrot.slane %v1116_v50, 2  ;;  %v1092_v15 = vrot.slane %v1091_v47, 1 }
 0x169   :  { %v1118_v13 = vadd.f32 %v1117_v4, %v1116_v50  ;;  %v1093_v0 = vadd.f32 %v1092_v15, %v1091_v47 }
 0x16b   :  { %v1119_v39 = vrot.slane %v1118_v13, 1 }
 0x16d   :  { %v1120_v12 = vadd.f32 %v1119_v39, %v1118_v13 }
 0x19b   :  { %v1034_v48 = vpop.xlane.xlu0 %1033 }
 0x19c   :  { %v1035_v17 = vrot.slane %v1034_v48, 4 }
 0x19e   :  { %v1036_v59 = vadd.f32 %v1035_v17, %v1034_v48 }
 0x19f   :  { %v1060_v55 = vpop.xlane.xlu0 %1059 }
 0x1a0   :  { %v1037_v51 = vrot.slane %v1036_v59, 2  ;;  %v1061_v20 = vrot.slane %v1060_v55, 4 }
 0x1a2   :  { %v1062_v16 = vadd.f32 %v1061_v20, %v1060_v55  ;;  %v1038_v32 = vadd.f32 %v1037_v51, %v1036_v59 }
 0x1a4   :  { %v1063_v45 = vrot.slane %v1062_v16, 2  ;;  %v1039_v43 = vrot.slane %v1038_v32, 1 }
 0x1a6   :  { %v1064_v57 = vadd.f32 %v1063_v45, %v1062_v16  ;;  %v1040_v53 = vadd.f32 %v1039_v43, %v1038_v32 }
 0x1a8   :  { %1173 = vpush %v1040_v53  ;;  %v1065_v61 = vrot.slane %v1064_v57, 1 }
 0x1aa   :  { %v1066_v18 = vadd.f32 %v1065_v61, %v1064_v57 }
 0x1ac   :  { %1175 = vpush %v1066_v18 }
 0x1ad   :  { %1177 = vpush %v1093_v0 }
 0x1ae   :  { %1179 = vpush %v1120_v12 }
 0x1d9   :  { %s1174_s5 = spop %1173 }
 0x1da   :  { %v1042_v5 = vstv %s1174_s5 }
 0x1db   :  { %v1043_v27 = vsel %vm1017_vm7, %v1042_v5, 0.0 }
 0x1dd   :  { %s1176_s21 = spop %1175 }
 0x1de   :  { %v1068_v29 = vstv %s1176_s21  ;;  %s1178_s22 = spop %1177 }
 0x1df   :  { %v1069_v24 = vsel %vm1044_vm8, %v1068_v29, 0.0  ;;  %v1095_v37 = vstv %s1178_s22  ;;  %s1180_s23 = spop %1179 }
 0x1e0   :  { %v1070_v30 = vadd.f32 %v1069_v24, %v1043_v27  ;;  %v1122_v1 = vstv %s1180_s23  ;;  %v1096_v60 = vsel %vm1071_vm9, %v1095_v37, 0.0 }
 0x1e1   :  { %v1123_v31 = vsel %vm1098_vm10, %v1122_v1, 0.0 }
 0x1e2   :  { %v1097_v49 = vadd.f32 %v1096_v60, %v1070_v30 }
 0x1e4   :  { %v1124_v19 = vadd.f32 %v1123_v31, %v1097_v49 }
 0x1e6   :  { %1125 = vst [vmem:[#allocation9] sm:$0xff] %v1124_v19 }
 0x1e7   :  { %1364 = shalt.err (!%p1361_p8)
}
 0x1e8   :  { %s1365_s30 = scalar_lea.hbm %s2042_s6, 128 }
 0x1e9   :  { %p1366_p9 = scmp.ne.s32.totalorder %s2042_s6, %s1365_s30  ;;  %p1369_p10 = scmp.lt.u32.totalorder %s1365_s30, %s2042_s6 }
 0x1eb   :  { %p1371_p11 = pnand %p1369_p10, %p1366_p9 }
 0x1ed   :  { %1374 = shalt.err (!%p1371_p11)
}
 0x1ee   :  { %1145 = dma.vmem_to_hbm [thread:$0]  %s1143_s26, 128, %s2042_s6, [#allocation10]  }
 0x1ef   :  { %1379 = dma.done.wait [#allocation4], 32  }
 0x1f0   :  { %1380 = vsyncadd [#allocation4], 4294967264 }
 0x1f1   :  { %1381 = dma.done.wait [#allocation10], 128  }
 0x1f2   :  { %1382 = vsyncadd [#allocation10], 4294967168 }
 0x1f3   :  { %1152 = vsyncpa [#allocation3], 1 }
 0x1f4   :  { %1153 = vsyncpa [#allocation6], 1 }
 0x1f5   :  { %1154 = vsyncpa [#allocation4], 1 }
 0x1f6   :  { %1155 = vsyncpa [#allocation10], 1 }

</bundles_post_ra>
